<compile_context>
chip_gen: v7x
topology: tpu7x:2x2x1
jax: 0.10.0
libtpu: 0.0.40
codegen_flags: <defaults>
</compile_context>

<pallas_src>
import jax
import jax.numpy as jnp
from jax.experimental import pallas as pl
from jax.experimental.pallas import tpu as pltpu


NUM_CLASSES = 8
N_PAD = 128          # lane-dense padded width of the classifier head output


# ----------------------------- fused Pallas kernel -----------------------------

def fused_forward_kernel(xp_ref, w1_ref, b1_ref, w2_ref, b2_ref, wc_ref, bc_ref,
                         o_ref, f1_ref):
    # xp_ref : (1, H+2, W+2, Cin) f32   spatially zero-padded NHWC input tile (one batch elem)
    # w1_ref : (9, Cin, C1) bf16        conv1 weights, one (Cin, C1) slab per 3x3 tap
    # w2_ref : (9, C1, C2) bf16
    # wc_ref : (C2, 128) bf16           classifier weights, zero-padded to 128 lanes
    # o_ref  : (1, 1, 128) f32          padded logits for this batch element
    # f1_ref : (H+2, W+2, C1) f32 VMEM  scratch holding zero-padded conv1 activations
    _, Hp, Wp, Cin = xp_ref.shape
    H, W = Hp - 2, Wp - 2
    HW = H * W
    C1 = w1_ref.shape[2]
    C2 = w2_ref.shape[2]

    # ---- conv1 (3x3 SAME) + bias + ReLU: 9 shifted-tap MXU dots, in-kernel patch extraction ----
    xp = xp_ref[0]                                            # (Hp, Wp, Cin) f32
    acc1 = jnp.zeros((HW, C1), jnp.float32)
    for t in range(9):
        di, dj = divmod(t, 3)
        tap = xp[di:di + H, dj:dj + W, :].reshape(HW, Cin).astype(jnp.bfloat16)
        acc1 = acc1 + jnp.dot(tap, w1_ref[t], preferred_element_type=jnp.float32)
    f1 = jnp.maximum(acc1 + b1_ref[...], 0.0)                 # (HW, C1) f32

    # ---- stage conv1 output in a zero-padded VMEM scratch (never written to HBM) ----
    f1_ref[...] = jnp.zeros_like(f1_ref)
    f1_ref[1:1 + H, 1:1 + W, :] = f1.reshape(H, W, C1)

    # ---- conv2 (3x3 SAME) + bias + ReLU ----
    acc2 = jnp.zeros((HW, C2), jnp.float32)
    for t in range(9):
        di, dj = divmod(t, 3)
        tap = f1_ref[di:di + H, dj:dj + W, :].reshape(HW, C1).astype(jnp.bfloat16)
        acc2 = acc2 + jnp.dot(tap, w2_ref[t], preferred_element_type=jnp.float32)
    f2 = jnp.maximum(acc2 + b2_ref[...], 0.0)                 # (HW, C2) f32

    # ---- replaced classifier head: global-avg-pool as a (1/HW)-ones MXU matmul + Linear ----
    pool_vec = jnp.full((1, HW), 1.0 / HW, jnp.bfloat16)      # 1/256 is exact in bf16
    pooled = jnp.dot(pool_vec, f2.astype(jnp.bfloat16),
                     preferred_element_type=jnp.float32)      # (1, C2) f32
    logits = jnp.dot(pooled.astype(jnp.bfloat16), wc_ref[...],
                     preferred_element_type=jnp.float32) + bc_ref[...]   # (1, 128) f32
    o_ref[0] = logits                                         # full 128-lane (unmasked) store


# ----------------------------- wrapper ------------------------------------------

def my_classifier_model_forward(params, image_nchw, num_classes=NUM_CLASSES):
    """Equivalent of MyClassifierModel.forward(image) -> Backbone(image)."""
    B, Cin, H, W = image_nchw.shape
    Hp, Wp = H + 2, W + 2
    C1 = params["w1"].shape[2]
    C2 = params["w2"].shape[2]
    NP = params["wc"].shape[1]
    HW = H * W

    x = jnp.transpose(image_nchw, (0, 2, 3, 1)).astype(jnp.float32)   # NCHW -> NHWC
    xp = jnp.pad(x, ((0, 0), (1, 1), (1, 1), (0, 0)))                 # SAME spatial padding

    flops = B * (2 * HW * 9 * Cin * C1 + 2 * HW * 9 * C1 * C2 + 2 * HW * C2 + 2 * C2 * NP)
    bytes_accessed = (xp.size * 4
                      + params["w1"].size * 2 + params["w2"].size * 2 + params["wc"].size * 2
                      + params["b1"].size * 4 + params["b2"].size * 4 + params["bc"].size * 4
                      + B * NP * 4)

    out = pl.pallas_call(
        fused_forward_kernel,
        out_shape=jax.ShapeDtypeStruct((B, 1, NP), jnp.float32),
        grid_spec=pltpu.PrefetchScalarGridSpec(
            num_scalar_prefetch=0,
            grid=(B,),
            in_specs=[
                pl.BlockSpec((1, Hp, Wp, Cin), lambda b: (b, 0, 0, 0)),   # per-batch input tile
                pl.BlockSpec((9, Cin, C1), lambda b: (0, 0, 0)),          # weights shared
                pl.BlockSpec((1, C1), lambda b: (0, 0)),
                pl.BlockSpec((9, C1, C2), lambda b: (0, 0, 0)),
                pl.BlockSpec((1, C2), lambda b: (0, 0)),
                pl.BlockSpec((C2, NP), lambda b: (0, 0)),
                pl.BlockSpec((1, NP), lambda b: (0, 0)),
            ],
            out_specs=pl.BlockSpec((1, 1, NP), lambda b: (b, 0, 0)),
            scratch_shapes=[pltpu.VMEM((Hp, Wp, C1), jnp.float32)],
        ),
        compiler_params=pltpu.CompilerParams(
            dimension_semantics=("parallel",),       # batch elems independent -> megacore on v7x
            vmem_limit_bytes=32 * 1024 * 1024,
        ),
        cost_estimate=pl.CostEstimate(
            flops=flops, transcendentals=0, bytes_accessed=bytes_accessed),
    )(xp, params["w1"], params["b1"], params["w2"], params["b2"],
      params["wc"], params["bc"])

    return out.reshape(B, NP)[:, :num_classes]


# ----------------------------- params & plain-JAX reference ---------------------

def init_params(key, in_ch=3, c1=16, c2=32, num_classes=NUM_CLASSES, n_pad=N_PAD):
    ks = jax.random.split(key, 6)
    s = 0.1
    w1 = s * jax.random.normal(ks[0], (9, in_ch, c1), jnp.float32)
    b1 = s * jax.random.normal(ks[1], (1, c1), jnp.float32)
    w2 = s * jax.random.normal(ks[2], (9, c1, c2), jnp.float32)
    b2 = s * jax.random.normal(ks[3], (1, c2), jnp.float32)
    wc = s * jax.random.normal(ks[4], (c2, num_classes), jnp.float32)
    bc = s * jax.random.normal(ks[5], (1, num_classes), jnp.float32)
    wc_p = jnp.zeros((c2, n_pad), jnp.float32).at[:, :num_classes].set(wc)
    bc_p = jnp.zeros((1, n_pad), jnp.float32).at[:, :num_classes].set(bc)
    return {
        "w1": w1.astype(jnp.bfloat16), "b1": b1,
        "w2": w2.astype(jnp.bfloat16), "b2": b2,
        "wc": wc_p.astype(jnp.bfloat16), "bc": bc_p,
    }


def reference_forward(params, image_nchw, num_classes=NUM_CLASSES):
    """Plain-JAX reference mirroring the kernel's bf16-input / f32-accumulate math."""
    B, Cin, H, W = image_nchw.shape
    x = jnp.transpose(image_nchw, (0, 2, 3, 1)).astype(jnp.float32)
    xp = jnp.pad(x, ((0, 0), (1, 1), (1, 1), (0, 0)))

    def rounded(a):
        return a.astype(jnp.bfloat16).astype(jnp.float32)

    def conv3x3_same(src_pad, w_bf16, b):
        cout = w_bf16.shape[2]
        w = w_bf16.astype(jnp.float32)
        acc = jnp.zeros((B, H, W, cout), jnp.float32)
        for t in range(9):
            di, dj = divmod(t, 3)
            tap = rounded(src_pad[:, di:di + H, dj:dj + W, :])
            acc = acc + jnp.einsum("bhwc,cd->bhwd", tap, w[t])
        return jnp.maximum(acc + b.reshape(1, 1, 1, cout), 0.0)

    f1 = conv3x3_same(xp, params["w1"], params["b1"])
    f1p = jnp.pad(f1, ((0, 0), (1, 1), (1, 1), (0, 0)))
    f2 = conv3x3_same(f1p, params["w2"], params["b2"])
    pooled = jnp.mean(rounded(f2), axis=(1, 2))                         # (B, C2)
    logits = rounded(pooled) @ params["wc"].astype(jnp.float32) + params["bc"]
    return logits[:, :num_classes]


if __name__ == "__main__":
    key = jax.random.PRNGKey(0)
    pkey, xkey = jax.random.split(key)

    params = init_params(pkey)
    image = jax.random.normal(xkey, (2, 3, 16, 16), jnp.float32)        # NCHW, like PyTorch

    fwd = jax.jit(my_classifier_model_forward)
    out = jax.block_until_ready(fwd(params, image))
    assert out.shape == (2, NUM_CLASSES)

    ref = reference_forward(params, image)
    err = jnp.max(jnp.abs(out - ref))
    ok = bool(jnp.all(jnp.abs(out - ref) <= (2e-3 + 2e-3 * jnp.abs(ref))))
    assert ok, f"kernel/reference mismatch, max abs err = {err}"
    print("KERNEL_OK")
</pallas_src>

<mosaic_0001>
module attributes {stable_mosaic.version = 11 : i64} {
  func.func @fused_forward_kernel(%arg0: i32, %arg1: memref<1x18x18x3xf32, #tpu.memory_space<vmem>>, %arg2: memref<9x3x16xbf16, #tpu.memory_space<vmem>>, %arg3: memref<1x16xf32, #tpu.memory_space<vmem>>, %arg4: memref<9x16x32xbf16, #tpu.memory_space<vmem>>, %arg5: memref<1x32xf32, #tpu.memory_space<vmem>>, %arg6: memref<32x128xbf16, #tpu.memory_space<vmem>>, %arg7: memref<1x128xf32, #tpu.memory_space<vmem>>, %arg8: memref<1x1x128xf32, #tpu.memory_space<vmem>>, %arg9: memref<18x18x16xf32, #tpu.memory_space<vmem>>) attributes {dimension_semantics = [#tpu.dimension_semantics<parallel>], iteration_bounds = array<i64: 2>, scalar_prefetch = 0 : i64, scratch_operands = 1 : i64, tpu.core_type = #tpu.core_type<tc>, window_params = [{transform_indices = @transform_0, window_bounds = array<i64: 1, 18, 18, 3>}, {pipeline_mode = #tpu.pipeline_mode<synchronous>, transform_indices = @transform_1, window_bounds = array<i64: 9, 3, 16>}, {pipeline_mode = #tpu.pipeline_mode<synchronous>, transform_indices = @transform_2, window_bounds = array<i64: 1, 16>}, {pipeline_mode = #tpu.pipeline_mode<synchronous>, transform_indices = @transform_3, window_bounds = array<i64: 9, 16, 32>}, {pipeline_mode = #tpu.pipeline_mode<synchronous>, transform_indices = @transform_4, window_bounds = array<i64: 1, 32>}, {pipeline_mode = #tpu.pipeline_mode<synchronous>, transform_indices = @transform_5, window_bounds = array<i64: 32, 128>}, {pipeline_mode = #tpu.pipeline_mode<synchronous>, transform_indices = @transform_6, window_bounds = array<i64: 1, 128>}, {transform_indices = @transform_7, window_bounds = array<i64: 1, 1, 128>}]} {
    %c0 = arith.constant 0 : index
    %c0_0 = arith.constant 0 : index
    %c0_1 = arith.constant 0 : index
    %c0_2 = arith.constant 0 : index
    %0 = vector.load %arg1[%c0, %c0_0, %c0_1, %c0_2] : memref<1x18x18x3xf32, #tpu.memory_space<vmem>>, vector<1x18x18x3xf32>
    %1 = vector.shape_cast %0 : vector<1x18x18x3xf32> to vector<18x18x3xf32>
    %cst = arith.constant 0.000000e+00 : f32
    %2 = vector.broadcast %cst : f32 to vector<256x16xf32>
    %3 = vector.extract_strided_slice %1 {offsets = [0, 0, 0], sizes = [16, 16, 3], strides = [1, 1, 1]} : vector<18x18x3xf32> to vector<16x16x3xf32>
    %4 = vector.shape_cast %3 : vector<16x16x3xf32> to vector<256x3xf32>
    %5 = arith.truncf %4 : vector<256x3xf32> to vector<256x3xbf16>
    %c0_3 = arith.constant 0 : index
    %c0_4 = arith.constant 0 : index
    %c0_5 = arith.constant 0 : index
    %6 = vector.load %arg2[%c0_3, %c0_4, %c0_5] : memref<9x3x16xbf16, #tpu.memory_space<vmem>>, vector<1x3x16xbf16>
    %7 = vector.shape_cast %6 : vector<1x3x16xbf16> to vector<3x16xbf16>
    %cst_6 = arith.constant dense<0.000000e+00> : vector<256x16xf32>
    %8 = tpu.matmul %5, %7, %cst_6 {dimension_numbers = #tpu.dot_dimension_numbers<[1], [0], [0], [1], [0, 0, 1, 1], [], []>} : vector<256x3xbf16>, vector<3x16xbf16>, vector<256x16xf32> -> vector<256x16xf32>
    %9 = arith.addf %2, %8 : vector<256x16xf32>
    %10 = vector.extract_strided_slice %1 {offsets = [0, 1, 0], sizes = [16, 16, 3], strides = [1, 1, 1]} : vector<18x18x3xf32> to vector<16x16x3xf32>
    %11 = vector.shape_cast %10 : vector<16x16x3xf32> to vector<256x3xf32>
    %12 = arith.truncf %11 : vector<256x3xf32> to vector<256x3xbf16>
    %c1 = arith.constant 1 : index
    %c0_7 = arith.constant 0 : index
    %c0_8 = arith.constant 0 : index
    %13 = vector.load %arg2[%c1, %c0_7, %c0_8] : memref<9x3x16xbf16, #tpu.memory_space<vmem>>, vector<1x3x16xbf16>
    %14 = vector.shape_cast %13 : vector<1x3x16xbf16> to vector<3x16xbf16>
    %cst_9 = arith.constant dense<0.000000e+00> : vector<256x16xf32>
    %15 = tpu.matmul %12, %14, %cst_9 {dimension_numbers = #tpu.dot_dimension_numbers<[1], [0], [0], [1], [0, 0, 1, 1], [], []>} : vector<256x3xbf16>, vector<3x16xbf16>, vector<256x16xf32> -> vector<256x16xf32>
    %16 = arith.addf %9, %15 : vector<256x16xf32>
    %17 = vector.extract_strided_slice %1 {offsets = [0, 2, 0], sizes = [16, 16, 3], strides = [1, 1, 1]} : vector<18x18x3xf32> to vector<16x16x3xf32>
    %18 = vector.shape_cast %17 : vector<16x16x3xf32> to vector<256x3xf32>
    %19 = arith.truncf %18 : vector<256x3xf32> to vector<256x3xbf16>
    %c2 = arith.constant 2 : index
    %c0_10 = arith.constant 0 : index
    %c0_11 = arith.constant 0 : index
    %20 = vector.load %arg2[%c2, %c0_10, %c0_11] : memref<9x3x16xbf16, #tpu.memory_space<vmem>>, vector<1x3x16xbf16>
    %21 = vector.shape_cast %20 : vector<1x3x16xbf16> to vector<3x16xbf16>
    %cst_12 = arith.constant dense<0.000000e+00> : vector<256x16xf32>
    %22 = tpu.matmul %19, %21, %cst_12 {dimension_numbers = #tpu.dot_dimension_numbers<[1], [0], [0], [1], [0, 0, 1, 1], [], []>} : vector<256x3xbf16>, vector<3x16xbf16>, vector<256x16xf32> -> vector<256x16xf32>
    %23 = arith.addf %16, %22 : vector<256x16xf32>
    %24 = vector.extract_strided_slice %1 {offsets = [1, 0, 0], sizes = [16, 16, 3], strides = [1, 1, 1]} : vector<18x18x3xf32> to vector<16x16x3xf32>
    %25 = vector.shape_cast %24 : vector<16x16x3xf32> to vector<256x3xf32>
    %26 = arith.truncf %25 : vector<256x3xf32> to vector<256x3xbf16>
    %c3 = arith.constant 3 : index
    %c0_13 = arith.constant 0 : index
    %c0_14 = arith.constant 0 : index
    %27 = vector.load %arg2[%c3, %c0_13, %c0_14] : memref<9x3x16xbf16, #tpu.memory_space<vmem>>, vector<1x3x16xbf16>
    %28 = vector.shape_cast %27 : vector<1x3x16xbf16> to vector<3x16xbf16>
    %cst_15 = arith.constant dense<0.000000e+00> : vector<256x16xf32>
    %29 = tpu.matmul %26, %28, %cst_15 {dimension_numbers = #tpu.dot_dimension_numbers<[1], [0], [0], [1], [0, 0, 1, 1], [], []>} : vector<256x3xbf16>, vector<3x16xbf16>, vector<256x16xf32> -> vector<256x16xf32>
    %30 = arith.addf %23, %29 : vector<256x16xf32>
    %31 = vector.extract_strided_slice %1 {offsets = [1, 1, 0], sizes = [16, 16, 3], strides = [1, 1, 1]} : vector<18x18x3xf32> to vector<16x16x3xf32>
    %32 = vector.shape_cast %31 : vector<16x16x3xf32> to vector<256x3xf32>
    %33 = arith.truncf %32 : vector<256x3xf32> to vector<256x3xbf16>
    %c4 = arith.constant 4 : index
    %c0_16 = arith.constant 0 : index
    %c0_17 = arith.constant 0 : index
    %34 = vector.load %arg2[%c4, %c0_16, %c0_17] : memref<9x3x16xbf16, #tpu.memory_space<vmem>>, vector<1x3x16xbf16>
    %35 = vector.shape_cast %34 : vector<1x3x16xbf16> to vector<3x16xbf16>
    %cst_18 = arith.constant dense<0.000000e+00> : vector<256x16xf32>
    %36 = tpu.matmul %33, %35, %cst_18 {dimension_numbers = #tpu.dot_dimension_numbers<[1], [0], [0], [1], [0, 0, 1, 1], [], []>} : vector<256x3xbf16>, vector<3x16xbf16>, vector<256x16xf32> -> vector<256x16xf32>
    %37 = arith.addf %30, %36 : vector<256x16xf32>
    %38 = vector.extract_strided_slice %1 {offsets = [1, 2, 0], sizes = [16, 16, 3], strides = [1, 1, 1]} : vector<18x18x3xf32> to vector<16x16x3xf32>
    %39 = vector.shape_cast %38 : vector<16x16x3xf32> to vector<256x3xf32>
    %40 = arith.truncf %39 : vector<256x3xf32> to vector<256x3xbf16>
    %c5 = arith.constant 5 : index
    %c0_19 = arith.constant 0 : index
    %c0_20 = arith.constant 0 : index
    %41 = vector.load %arg2[%c5, %c0_19, %c0_20] : memref<9x3x16xbf16, #tpu.memory_space<vmem>>, vector<1x3x16xbf16>
    %42 = vector.shape_cast %41 : vector<1x3x16xbf16> to vector<3x16xbf16>
    %cst_21 = arith.constant dense<0.000000e+00> : vector<256x16xf32>
    %43 = tpu.matmul %40, %42, %cst_21 {dimension_numbers = #tpu.dot_dimension_numbers<[1], [0], [0], [1], [0, 0, 1, 1], [], []>} : vector<256x3xbf16>, vector<3x16xbf16>, vector<256x16xf32> -> vector<256x16xf32>
    %44 = arith.addf %37, %43 : vector<256x16xf32>
    %45 = vector.extract_strided_slice %1 {offsets = [2, 0, 0], sizes = [16, 16, 3], strides = [1, 1, 1]} : vector<18x18x3xf32> to vector<16x16x3xf32>
    %46 = vector.shape_cast %45 : vector<16x16x3xf32> to vector<256x3xf32>
    %47 = arith.truncf %46 : vector<256x3xf32> to vector<256x3xbf16>
    %c6 = arith.constant 6 : index
    %c0_22 = arith.constant 0 : index
    %c0_23 = arith.constant 0 : index
    %48 = vector.load %arg2[%c6, %c0_22, %c0_23] : memref<9x3x16xbf16, #tpu.memory_space<vmem>>, vector<1x3x16xbf16>
    %49 = vector.shape_cast %48 : vector<1x3x16xbf16> to vector<3x16xbf16>
    %cst_24 = arith.constant dense<0.000000e+00> : vector<256x16xf32>
    %50 = tpu.matmul %47, %49, %cst_24 {dimension_numbers = #tpu.dot_dimension_numbers<[1], [0], [0], [1], [0, 0, 1, 1], [], []>} : vector<256x3xbf16>, vector<3x16xbf16>, vector<256x16xf32> -> vector<256x16xf32>
    %51 = arith.addf %44, %50 : vector<256x16xf32>
    %52 = vector.extract_strided_slice %1 {offsets = [2, 1, 0], sizes = [16, 16, 3], strides = [1, 1, 1]} : vector<18x18x3xf32> to vector<16x16x3xf32>
    %53 = vector.shape_cast %52 : vector<16x16x3xf32> to vector<256x3xf32>
    %54 = arith.truncf %53 : vector<256x3xf32> to vector<256x3xbf16>
    %c7 = arith.constant 7 : index
    %c0_25 = arith.constant 0 : index
    %c0_26 = arith.constant 0 : index
    %55 = vector.load %arg2[%c7, %c0_25, %c0_26] : memref<9x3x16xbf16, #tpu.memory_space<vmem>>, vector<1x3x16xbf16>
    %56 = vector.shape_cast %55 : vector<1x3x16xbf16> to vector<3x16xbf16>
    %cst_27 = arith.constant dense<0.000000e+00> : vector<256x16xf32>
    %57 = tpu.matmul %54, %56, %cst_27 {dimension_numbers = #tpu.dot_dimension_numbers<[1], [0], [0], [1], [0, 0, 1, 1], [], []>} : vector<256x3xbf16>, vector<3x16xbf16>, vector<256x16xf32> -> vector<256x16xf32>
    %58 = arith.addf %51, %57 : vector<256x16xf32>
    %59 = vector.extract_strided_slice %1 {offsets = [2, 2, 0], sizes = [16, 16, 3], strides = [1, 1, 1]} : vector<18x18x3xf32> to vector<16x16x3xf32>
    %60 = vector.shape_cast %59 : vector<16x16x3xf32> to vector<256x3xf32>
    %61 = arith.truncf %60 : vector<256x3xf32> to vector<256x3xbf16>
    %c8 = arith.constant 8 : index
    %c0_28 = arith.constant 0 : index
    %c0_29 = arith.constant 0 : index
    %62 = vector.load %arg2[%c8, %c0_28, %c0_29] : memref<9x3x16xbf16, #tpu.memory_space<vmem>>, vector<1x3x16xbf16>
    %63 = vector.shape_cast %62 : vector<1x3x16xbf16> to vector<3x16xbf16>
    %cst_30 = arith.constant dense<0.000000e+00> : vector<256x16xf32>
    %64 = tpu.matmul %61, %63, %cst_30 {dimension_numbers = #tpu.dot_dimension_numbers<[1], [0], [0], [1], [0, 0, 1, 1], [], []>} : vector<256x3xbf16>, vector<3x16xbf16>, vector<256x16xf32> -> vector<256x16xf32>
    %65 = arith.addf %58, %64 : vector<256x16xf32>
    %c0_31 = arith.constant 0 : index
    %c0_32 = arith.constant 0 : index
    %66 = vector.load %arg3[%c0_31, %c0_32] : memref<1x16xf32, #tpu.memory_space<vmem>>, vector<1x16xf32>
    %67 = vector.broadcast %66 : vector<1x16xf32> to vector<256x16xf32>
    %68 = arith.addf %65, %67 : vector<256x16xf32>
    %cst_33 = arith.constant 0.000000e+00 : f32
    %69 = vector.broadcast %cst_33 : f32 to vector<256x16xf32>
    %70 = arith.maximumf %68, %69 : vector<256x16xf32>
    %cst_34 = arith.constant 0.000000e+00 : f32
    %71 = vector.broadcast %cst_34 : f32 to vector<18x18x16xf32>
    %c0_35 = arith.constant 0 : index
    %c0_36 = arith.constant 0 : index
    %c0_37 = arith.constant 0 : index
    %72 = vector.load %arg9[%c0_35, %c0_36, %c0_37] : memref<18x18x16xf32, #tpu.memory_space<vmem>>, vector<18x18x16xf32>
    tpu.vector_store %arg9[%c0_35, %c0_36, %c0_37], %71 {strides = array<i32>} : memref<18x18x16xf32, #tpu.memory_space<vmem>>, vector<18x18x16xf32>,
    %73 = vector.shape_cast %70 : vector<256x16xf32> to vector<16x16x16xf32>
    %c1_38 = arith.constant 1 : index
    %c1_39 = arith.constant 1 : index
    %c0_40 = arith.constant 0 : index
    %74 = vector.load %arg9[%c1_38, %c1_39, %c0_40] : memref<18x18x16xf32, #tpu.memory_space<vmem>>, vector<16x16x16xf32>
    tpu.vector_store %arg9[%c1_38, %c1_39, %c0_40], %73 {strides = array<i32>} : memref<18x18x16xf32, #tpu.memory_space<vmem>>, vector<16x16x16xf32>,
    %cst_41 = arith.constant 0.000000e+00 : f32
    %75 = vector.broadcast %cst_41 : f32 to vector<256x32xf32>
    %c0_42 = arith.constant 0 : index
    %c0_43 = arith.constant 0 : index
    %c0_44 = arith.constant 0 : index
    %76 = vector.load %arg9[%c0_42, %c0_43, %c0_44] : memref<18x18x16xf32, #tpu.memory_space<vmem>>, vector<16x16x16xf32>
    %77 = vector.shape_cast %76 : vector<16x16x16xf32> to vector<256x16xf32>
    %78 = arith.truncf %77 : vector<256x16xf32> to vector<256x16xbf16>
    %c0_45 = arith.constant 0 : index
    %c0_46 = arith.constant 0 : index
    %c0_47 = arith.constant 0 : index
    %79 = vector.load %arg4[%c0_45, %c0_46, %c0_47] : memref<9x16x32xbf16, #tpu.memory_space<vmem>>, vector<1x16x32xbf16>
    %80 = vector.shape_cast %79 : vector<1x16x32xbf16> to vector<16x32xbf16>
    %cst_48 = arith.constant dense<0.000000e+00> : vector<256x32xf32>
    %81 = tpu.matmul %78, %80, %cst_48 {dimension_numbers = #tpu.dot_dimension_numbers<[1], [0], [0], [1], [0, 0, 1, 1], [], []>} : vector<256x16xbf16>, vector<16x32xbf16>, vector<256x32xf32> -> vector<256x32xf32>
    %82 = arith.addf %75, %81 : vector<256x32xf32>
    %c0_49 = arith.constant 0 : index
    %c1_50 = arith.constant 1 : index
    %c0_51 = arith.constant 0 : index
    %83 = vector.load %arg9[%c0_49, %c1_50, %c0_51] : memref<18x18x16xf32, #tpu.memory_space<vmem>>, vector<16x16x16xf32>
    %84 = vector.shape_cast %83 : vector<16x16x16xf32> to vector<256x16xf32>
    %85 = arith.truncf %84 : vector<256x16xf32> to vector<256x16xbf16>
    %c1_52 = arith.constant 1 : index
    %c0_53 = arith.constant 0 : index
    %c0_54 = arith.constant 0 : index
    %86 = vector.load %arg4[%c1_52, %c0_53, %c0_54] : memref<9x16x32xbf16, #tpu.memory_space<vmem>>, vector<1x16x32xbf16>
    %87 = vector.shape_cast %86 : vector<1x16x32xbf16> to vector<16x32xbf16>
    %cst_55 = arith.constant dense<0.000000e+00> : vector<256x32xf32>
    %88 = tpu.matmul %85, %87, %cst_55 {dimension_numbers = #tpu.dot_dimension_numbers<[1], [0], [0], [1], [0, 0, 1, 1], [], []>} : vector<256x16xbf16>, vector<16x32xbf16>, vector<256x32xf32> -> vector<256x32xf32>
    %89 = arith.addf %82, %88 : vector<256x32xf32>
    %c0_56 = arith.constant 0 : index
    %c2_57 = arith.constant 2 : index
    %c0_58 = arith.constant 0 : index
    %90 = vector.load %arg9[%c0_56, %c2_57, %c0_58] : memref<18x18x16xf32, #tpu.memory_space<vmem>>, vector<16x16x16xf32>
    %91 = vector.shape_cast %90 : vector<16x16x16xf32> to vector<256x16xf32>
    %92 = arith.truncf %91 : vector<256x16xf32> to vector<256x16xbf16>
    %c2_59 = arith.constant 2 : index
    %c0_60 = arith.constant 0 : index
    %c0_61 = arith.constant 0 : index
    %93 = vector.load %arg4[%c2_59, %c0_60, %c0_61] : memref<9x16x32xbf16, #tpu.memory_space<vmem>>, vector<1x16x32xbf16>
    %94 = vector.shape_cast %93 : vector<1x16x32xbf16> to vector<16x32xbf16>
    %cst_62 = arith.constant dense<0.000000e+00> : vector<256x32xf32>
    %95 = tpu.matmul %92, %94, %cst_62 {dimension_numbers = #tpu.dot_dimension_numbers<[1], [0], [0], [1], [0, 0, 1, 1], [], []>} : vector<256x16xbf16>, vector<16x32xbf16>, vector<256x32xf32> -> vector<256x32xf32>
    %96 = arith.addf %89, %95 : vector<256x32xf32>
    %c1_63 = arith.constant 1 : index
    %c0_64 = arith.constant 0 : index
    %c0_65 = arith.constant 0 : index
    %97 = vector.load %arg9[%c1_63, %c0_64, %c0_65] : memref<18x18x16xf32, #tpu.memory_space<vmem>>, vector<16x16x16xf32>
    %98 = vector.shape_cast %97 : vector<16x16x16xf32> to vector<256x16xf32>
    %99 = arith.truncf %98 : vector<256x16xf32> to vector<256x16xbf16>
    %c3_66 = arith.constant 3 : index
    %c0_67 = arith.constant 0 : index
    %c0_68 = arith.constant 0 : index
    %100 = vector.load %arg4[%c3_66, %c0_67, %c0_68] : memref<9x16x32xbf16, #tpu.memory_space<vmem>>, vector<1x16x32xbf16>
    %101 = vector.shape_cast %100 : vector<1x16x32xbf16> to vector<16x32xbf16>
    %cst_69 = arith.constant dense<0.000000e+00> : vector<256x32xf32>
    %102 = tpu.matmul %99, %101, %cst_69 {dimension_numbers = #tpu.dot_dimension_numbers<[1], [0], [0], [1], [0, 0, 1, 1], [], []>} : vector<256x16xbf16>, vector<16x32xbf16>, vector<256x32xf32> -> vector<256x32xf32>
    %103 = arith.addf %96, %102 : vector<256x32xf32>
    %c1_70 = arith.constant 1 : index
    %c1_71 = arith.constant 1 : index
    %c0_72 = arith.constant 0 : index
    %104 = vector.load %arg9[%c1_70, %c1_71, %c0_72] : memref<18x18x16xf32, #tpu.memory_space<vmem>>, vector<16x16x16xf32>
    %105 = vector.shape_cast %104 : vector<16x16x16xf32> to vector<256x16xf32>
    %106 = arith.truncf %105 : vector<256x16xf32> to vector<256x16xbf16>
    %c4_73 = arith.constant 4 : index
    %c0_74 = arith.constant 0 : index
    %c0_75 = arith.constant 0 : index
    %107 = vector.load %arg4[%c4_73, %c0_74, %c0_75] : memref<9x16x32xbf16, #tpu.memory_space<vmem>>, vector<1x16x32xbf16>
    %108 = vector.shape_cast %107 : vector<1x16x32xbf16> to vector<16x32xbf16>
    %cst_76 = arith.constant dense<0.000000e+00> : vector<256x32xf32>
    %109 = tpu.matmul %106, %108, %cst_76 {dimension_numbers = #tpu.dot_dimension_numbers<[1], [0], [0], [1], [0, 0, 1, 1], [], []>} : vector<256x16xbf16>, vector<16x32xbf16>, vector<256x32xf32> -> vector<256x32xf32>
    %110 = arith.addf %103, %109 : vector<256x32xf32>
    %c1_77 = arith.constant 1 : index
    %c2_78 = arith.constant 2 : index
    %c0_79 = arith.constant 0 : index
    %111 = vector.load %arg9[%c1_77, %c2_78, %c0_79] : memref<18x18x16xf32, #tpu.memory_space<vmem>>, vector<16x16x16xf32>
    %112 = vector.shape_cast %111 : vector<16x16x16xf32> to vector<256x16xf32>
    %113 = arith.truncf %112 : vector<256x16xf32> to vector<256x16xbf16>
    %c5_80 = arith.constant 5 : index
    %c0_81 = arith.constant 0 : index
    %c0_82 = arith.constant 0 : index
    %114 = vector.load %arg4[%c5_80, %c0_81, %c0_82] : memref<9x16x32xbf16, #tpu.memory_space<vmem>>, vector<1x16x32xbf16>
    %115 = vector.shape_cast %114 : vector<1x16x32xbf16> to vector<16x32xbf16>
    %cst_83 = arith.constant dense<0.000000e+00> : vector<256x32xf32>
    %116 = tpu.matmul %113, %115, %cst_83 {dimension_numbers = #tpu.dot_dimension_numbers<[1], [0], [0], [1], [0, 0, 1, 1], [], []>} : vector<256x16xbf16>, vector<16x32xbf16>, vector<256x32xf32> -> vector<256x32xf32>
    %117 = arith.addf %110, %116 : vector<256x32xf32>
    %c2_84 = arith.constant 2 : index
    %c0_85 = arith.constant 0 : index
    %c0_86 = arith.constant 0 : index
    %118 = vector.load %arg9[%c2_84, %c0_85, %c0_86] : memref<18x18x16xf32, #tpu.memory_space<vmem>>, vector<16x16x16xf32>
    %119 = vector.shape_cast %118 : vector<16x16x16xf32> to vector<256x16xf32>
    %120 = arith.truncf %119 : vector<256x16xf32> to vector<256x16xbf16>
    %c6_87 = arith.constant 6 : index
    %c0_88 = arith.constant 0 : index
    %c0_89 = arith.constant 0 : index
    %121 = vector.load %arg4[%c6_87, %c0_88, %c0_89] : memref<9x16x32xbf16, #tpu.memory_space<vmem>>, vector<1x16x32xbf16>
    %122 = vector.shape_cast %121 : vector<1x16x32xbf16> to vector<16x32xbf16>
    %cst_90 = arith.constant dense<0.000000e+00> : vector<256x32xf32>
    %123 = tpu.matmul %120, %122, %cst_90 {dimension_numbers = #tpu.dot_dimension_numbers<[1], [0], [0], [1], [0, 0, 1, 1], [], []>} : vector<256x16xbf16>, vector<16x32xbf16>, vector<256x32xf32> -> vector<256x32xf32>
    %124 = arith.addf %117, %123 : vector<256x32xf32>
    %c2_91 = arith.constant 2 : index
    %c1_92 = arith.constant 1 : index
    %c0_93 = arith.constant 0 : index
    %125 = vector.load %arg9[%c2_91, %c1_92, %c0_93] : memref<18x18x16xf32, #tpu.memory_space<vmem>>, vector<16x16x16xf32>
    %126 = vector.shape_cast %125 : vector<16x16x16xf32> to vector<256x16xf32>
    %127 = arith.truncf %126 : vector<256x16xf32> to vector<256x16xbf16>
    %c7_94 = arith.constant 7 : index
    %c0_95 = arith.constant 0 : index
    %c0_96 = arith.constant 0 : index
    %128 = vector.load %arg4[%c7_94, %c0_95, %c0_96] : memref<9x16x32xbf16, #tpu.memory_space<vmem>>, vector<1x16x32xbf16>
    %129 = vector.shape_cast %128 : vector<1x16x32xbf16> to vector<16x32xbf16>
    %cst_97 = arith.constant dense<0.000000e+00> : vector<256x32xf32>
    %130 = tpu.matmul %127, %129, %cst_97 {dimension_numbers = #tpu.dot_dimension_numbers<[1], [0], [0], [1], [0, 0, 1, 1], [], []>} : vector<256x16xbf16>, vector<16x32xbf16>, vector<256x32xf32> -> vector<256x32xf32>
    %131 = arith.addf %124, %130 : vector<256x32xf32>
    %c2_98 = arith.constant 2 : index
    %c2_99 = arith.constant 2 : index
    %c0_100 = arith.constant 0 : index
    %132 = vector.load %arg9[%c2_98, %c2_99, %c0_100] : memref<18x18x16xf32, #tpu.memory_space<vmem>>, vector<16x16x16xf32>
    %133 = vector.shape_cast %132 : vector<16x16x16xf32> to vector<256x16xf32>
    %134 = arith.truncf %133 : vector<256x16xf32> to vector<256x16xbf16>
    %c8_101 = arith.constant 8 : index
    %c0_102 = arith.constant 0 : index
    %c0_103 = arith.constant 0 : index
    %135 = vector.load %arg4[%c8_101, %c0_102, %c0_103] : memref<9x16x32xbf16, #tpu.memory_space<vmem>>, vector<1x16x32xbf16>
    %136 = vector.shape_cast %135 : vector<1x16x32xbf16> to vector<16x32xbf16>
    %cst_104 = arith.constant dense<0.000000e+00> : vector<256x32xf32>
    %137 = tpu.matmul %134, %136, %cst_104 {dimension_numbers = #tpu.dot_dimension_numbers<[1], [0], [0], [1], [0, 0, 1, 1], [], []>} : vector<256x16xbf16>, vector<16x32xbf16>, vector<256x32xf32> -> vector<256x32xf32>
    %138 = arith.addf %131, %137 : vector<256x32xf32>
    %c0_105 = arith.constant 0 : index
    %c0_106 = arith.constant 0 : index
    %139 = vector.load %arg5[%c0_105, %c0_106] : memref<1x32xf32, #tpu.memory_space<vmem>>, vector<1x32xf32>
    %140 = vector.broadcast %139 : vector<1x32xf32> to vector<256x32xf32>
    %141 = arith.addf %138, %140 : vector<256x32xf32>
    %cst_107 = arith.constant 0.000000e+00 : f32
    %142 = vector.broadcast %cst_107 : f32 to vector<256x32xf32>
    %143 = arith.maximumf %141, %142 : vector<256x32xf32>
    %cst_108 = arith.constant 3.906250e-03 : bf16
    %144 = vector.broadcast %cst_108 : bf16 to vector<1x256xbf16>
    %145 = arith.truncf %143 : vector<256x32xf32> to vector<256x32xbf16>
    %cst_109 = arith.constant dense<0.000000e+00> : vector<1x32xf32>
    %146 = tpu.matmul %144, %145, %cst_109 {dimension_numbers = #tpu.dot_dimension_numbers<[1], [0], [0], [1], [0, 0, 1, 1], [], []>} : vector<1x256xbf16>, vector<256x32xbf16>, vector<1x32xf32> -> vector<1x32xf32>
    %147 = arith.truncf %146 : vector<1x32xf32> to vector<1x32xbf16>
    %c0_110 = arith.constant 0 : index
    %c0_111 = arith.constant 0 : index
    %148 = vector.load %arg6[%c0_110, %c0_111] : memref<32x128xbf16, #tpu.memory_space<vmem>>, vector<32x128xbf16>
    %cst_112 = arith.constant dense<0.000000e+00> : vector<1x128xf32>
    %149 = tpu.matmul %147, %148, %cst_112 {dimension_numbers = #tpu.dot_dimension_numbers<[1], [0], [0], [1], [0, 0, 1, 1], [], []>} : vector<1x32xbf16>, vector<32x128xbf16>, vector<1x128xf32> -> vector<1x128xf32>
    %c0_113 = arith.constant 0 : index
    %c0_114 = arith.constant 0 : index
    %150 = vector.load %arg7[%c0_113, %c0_114] : memref<1x128xf32, #tpu.memory_space<vmem>>, vector<1x128xf32>
    %151 = arith.addf %149, %150 : vector<1x128xf32>
    %c0_115 = arith.constant 0 : index
    %c0_116 = arith.constant 0 : index
    %c0_117 = arith.constant 0 : index
    %152 = vector.load %arg8[%c0_115, %c0_116, %c0_117] : memref<1x1x128xf32, #tpu.memory_space<vmem>>, vector<1x1x128xf32>
    %153 = vector.shape_cast %152 : vector<1x1x128xf32> to vector<1x128xf32>
    %154 = vector.shape_cast %151 : vector<1x128xf32> to vector<1x1x128xf32>
    tpu.vector_store %arg8[%c0_115, %c0_116, %c0_117], %154 {strides = array<i32>} : memref<1x1x128xf32, #tpu.memory_space<vmem>>, vector<1x1x128xf32>,
    return
  }
  func.func @transform_0(%arg0: i32) -> (i32, i32, i32, i32) {
    %c0_i32 = arith.constant 0 : i32
    %c0_i32_0 = arith.constant 0 : i32
    %c0_i32_1 = arith.constant 0 : i32
    %c0_i32_2 = arith.constant 0 : i32
    return %arg0, %c0_i32, %c0_i32_0, %c0_i32_1 : i32, i32, i32, i32
  }
  func.func @transform_1(%arg0: i32) -> (i32, i32, i32) {
    %c0_i32 = arith.constant 0 : i32
    %c0_i32_0 = arith.constant 0 : i32
    %c0_i32_1 = arith.constant 0 : i32
    %c0_i32_2 = arith.constant 0 : i32
    return %c0_i32, %c0_i32_0, %c0_i32_1 : i32, i32, i32
  }
  func.func @transform_2(%arg0: i32) -> (i32, i32) {
    %c0_i32 = arith.constant 0 : i32
    %c0_i32_0 = arith.constant 0 : i32
    %c0_i32_1 = arith.constant 0 : i32
    return %c0_i32, %c0_i32_0 : i32, i32
  }
  func.func @transform_3(%arg0: i32) -> (i32, i32, i32) {
    %c0_i32 = arith.constant 0 : i32
    %c0_i32_0 = arith.constant 0 : i32
    %c0_i32_1 = arith.constant 0 : i32
    %c0_i32_2 = arith.constant 0 : i32
    return %c0_i32, %c0_i32_0, %c0_i32_1 : i32, i32, i32
  }
  func.func @transform_4(%arg0: i32) -> (i32, i32) {
    %c0_i32 = arith.constant 0 : i32
    %c0_i32_0 = arith.constant 0 : i32
    %c0_i32_1 = arith.constant 0 : i32
    return %c0_i32, %c0_i32_0 : i32, i32
  }
  func.func @transform_5(%arg0: i32) -> (i32, i32) {
    %c0_i32 = arith.constant 0 : i32
    %c0_i32_0 = arith.constant 0 : i32
    %c0_i32_1 = arith.constant 0 : i32
    return %c0_i32, %c0_i32_0 : i32, i32
  }
  func.func @transform_6(%arg0: i32) -> (i32, i32) {
    %c0_i32 = arith.constant 0 : i32
    %c0_i32_0 = arith.constant 0 : i32
    %c0_i32_1 = arith.constant 0 : i32
    return %c0_i32, %c0_i32_0 : i32, i32
  }
  func.func @transform_7(%arg0: i32) -> (i32, i32, i32) {
    %c0_i32 = arith.constant 0 : i32
    %c0_i32_0 = arith.constant 0 : i32
    %c0_i32_1 = arith.constant 0 : i32
    return %arg0, %c0_i32, %c0_i32_0 : i32, i32, i32
  }
}

</mosaic_0001>

<bundles_post_ra>
// kernel: my_classifier_model_forward.1
= control target key start
LH: loop header
LB: loop body
LE: loop exit
PB: predicated region body
PF: predicated region fallthrough
CT: control target
= control target key end

     0   :  { %12 = vsyncpa [#allocation4], 0  ;;  %s9130_s0 = inlined_call_operand.vmem [shape: f32[2,18,18,3], index: 0, kind: input, shape index: {}]   ;;  %s9131_s1 = inlined_call_operand.vmem [shape: bf16[9,3,16], index: 1, kind: input, shape index: {}]   ;;  %s9132_s2 = inlined_call_operand.vmem [shape: f32[1,16], index: 2, kind: input, shape index: {}]   ;;  %s9133_s3 = inlined_call_operand.vmem [shape: bf16[9,16,32], index: 3, kind: input, shape index: {}]   ;;  %s9134_s4 = inlined_call_operand.vmem [shape: f32[1,32], index: 4, kind: input, shape index: {}]   ;;  %s9135_s5 = inlined_call_operand.vmem [shape: bf16[32,128], index: 5, kind: input, shape index: {}]   ;;  %s9136_s6 = inlined_call_operand.vmem [shape: f32[1,128], index: 6, kind: input, shape index: {}]   ;;  %s9137_s7 = inlined_call_operand.hbm [shape: f32[2,1,128], index: 7, kind: output, shape index: {}]  }
   0x1   :  { %14 = vsyncpa [#allocation4 + $0x1], 0  ;;  %s7575_s24 = smov 0   ;;  %s7577_s25 = smov 0  }
   0x2   :  { %s7579_s26 = smov 0   ;;  %s7581_s27 = smov 0  }
   0x3 LB: > { %s7596_s28 = sadd.s32 4294967295, %s7528_s27   ;;  %s5614_s29 = sadd.s32 4294967294, %s7528_s27   ;;  %s7528_s27 = sphi %s7581_s27, %s9224_s27   ;;  %s7524_s26 = sphi %s7579_s26, %s9223_s26   ;;  %s7520_s25 = sphi %s7577_s25, %s9222_s25   ;;  %s7516_s24 = sphi %s7575_s24, %s9221_s24  }
   0x4   : > { %s7600_s30 = sadd.s32 1, %s7528_s27   ;;  %s179_s8 = sadd.s32 1, %s7524_s26 }
   0x5   : > { %s176_s9 = ssub.s32 %s7528_s27, %s7600_s30  ;;  %p189_p0 = scmp.ne.s32.totalorder %s7524_s26, %s7520_s25 }
   0x6   : > { %p177_p1 = scmp.eq.s32.totalorder %s176_s9, 0  ;;  %p190_p2 = scmp.eq.s32.totalorder %s7596_s28, 1 }
   0x7   : > { %p195_p3 = scmp.ne.s32.totalorder %s7520_s25, %s7516_s24  ;;  %p196_p4 = scmp.eq.s32.totalorder %s5614_s29, 1 }
   0x8   : > { %s7611_s10 = scalar_select %p177_p1, %s7524_s26, %s179_s8  }
   0x9   : > { %p7613_p5 = por %p190_p2, %p189_p0  ;;  %p7617_p6 = por %p196_p4, %p195_p3 }
   0xa   : > { %p5617_p7 = scmp.ge.s32.totalorder %s7528_s27, 1  ;;  %p240_p8 = scmp.lt.s32.totalorder %s7528_s27, 3 }
   0xc   : > { %p241_p9 = pnand %p5617_p7, %p240_p8 }
   0xe   : > { %244 = sbr.rel (%p241_p9) target bundleno = 2019 (0x7e3), region = 48 }
  0x15   : > { %v5619_v0 = vld [vmem:[%s9131_s1 + $0x2] sm:$0x3]  ;;  %vm577_vm0 = vcmask 1040384   ;;  %vm578_vm1 = vcmask 1041408   ;;  %p271_p10 = scmp.lt.s32.totalorder %s7596_s28, 1  ;;  %v7530_v1 = vmov 65535  }
  0x16   : > { %v579_v2 = vsel %vm577_vm0, 4294967295, %v7530_v1  ;;  %v348_v3 = vld [vmem:[%s9131_s1] sm:$0x3]  ;;  %v5652_v7 = vld [vmem:[%s9131_s1 + $0x4] sm:$0x3]  ;;  %vm397_vm2 = vcmask 1046528  }
  0x17   : > { %v7630_v4 = vsel %vm578_vm1, %v579_v2, 0  ;;  %s272_s17 = scalar_select %p271_p10, %s7596_s28, 1  ;;  %vm528_vm3 = vcmask 23552   ;;  %vm957_vm4 = vcmask 1045504   ;;  %vm2649_vm5 = vcmask 130048  }
  0x18   : > { %9168 = vst [vmem:[#allocation6_spill] sm:$0xff] %v7630_v4  ;;  %v582_v5 = vand.u32 %v5619_v0, %v7630_v4  ;;  %v794_v6 = vand.u32 %v7630_v4, %v348_v3  ;;  %v7689_v30 = vand.u32 %v5652_v7, %v7630_v4  ;;  %vm2652_vm6 = vcmask 123904   ;;  %s269_s20 = sand.u32 1, %s7520_s25   ;;  %s5945_s23 = sshll.u32 %s7596_s28, 4 }
  0x19   : > { %s7411_s18 = smul.u32 432, %s272_s17  ;;  %vm7533_vm7 = vmmov 0   ;;  %vm5501_vm8 = vcmask 261120   ;;  %s270_s29 = scalar_lea.vmem [#allocation3], %s269_s20 }
  0x1a   : > { %6279 = vmatprep.subr.bf16.mxu0 %v582_v5  ;;  %9169 = vst [vmem:[#allocation7_spill] sm:$0xff] %v7689_v30  ;;  %s5559_s8 = sshll.u32 %s270_s29, 4  ;;  %s9088_s14 = scalar_lea.hbm %s9137_s7, %s5945_s23  ;;  %s9090_s8 = int_to_ptr.vmem [resolvable:$true] %s5559_s8 }
  0x1b   : > { %6280 = vmatpush3.bf16.msra.mxu0 %v582_v5  ;;  %s7638_s21 = scalar_lea.vmem %s9130_s0, %s7411_s18  ;;  %s5547_s15 = scalar_lea.sflag [#allocation4], %s269_s20 }
  0x1c   : > { %v7644_v8 = vld [vmem:[%s7638_s21] sm:$0xff]  ;;  %v7647_v9 = vld [vmem:[%s7638_s21 + $0x8] sm:$0xff]  ;;  %v7650_v10 = vld [vmem:[%s7638_s21 + $0x10] sm:$0x3]  ;;  %6313 = vmatprep.subr.bf16.mxu0 %v794_v6  ;;  %s7466_s28 = scalar_lea.vmem %s9090_s8, 16  ;;  %s7534_s16 = smov [#allocation3]  }
  0x1d   : > { %v398_v11 = vrot.slane %v7644_v8, 1  ;;  %v399_v12 = vrot.slane %v7647_v9, 1  ;;  %v401_v13 = vrot.slane %v7650_v10, 1  ;;  %v7656_v14 = vld [vmem:[%s7638_s21 + $0x18] sm:$0xff]  ;;  %v7659_v15 = vld [vmem:[%s7638_s21 + $0x20] sm:$0xff]  ;;  %v7670_v22 = vld [vmem:[%s7638_s21 + $0x30] sm:$0xff]  ;;  %p7467_p11 = scmp.ne.s32.totalorder %s9090_s8, %s7466_s28 }
  0x1e   : > { %v7662_v16 = vld [vmem:[%s7638_s21 + $0x28] sm:$0x3]  ;;  %v403_v17 = vrot.slane %v7656_v14, 1  ;;  %v404_v18 = vrot.slane %v7659_v15, 1  ;;  %v7673_v23 = vld [vmem:[%s7638_s21 + $0x38] sm:$0xff]  ;;  %v7683_v28 = vld [vmem:[%s7638_s21 + $0x50] sm:$0xff] }
  0x1f   : > { %v400_v19 = vsel %vm397_vm2, %v398_v11, %v399_v12  ;;  %v402_v20 = vsel %vm397_vm2, %v399_v12, %v401_v13  ;;  %v406_v21 = vrot.slane %v7662_v16, 1  ;;  %v7676_v24 = vld [vmem:[%s7638_s21 + $0x40] sm:$0x3]  ;;  %v7680_v27 = vld [vmem:[%s7638_s21 + $0x48] sm:$0xff]  ;;  %v7686_v29 = vld [vmem:[%s7638_s21 + $0x58] sm:$0x3]  ;;  %p7468_p12 = pnand %p7467_p11, %p7613_p5 }
  0x20   : > { %v510_v25 = vpack.c.bf16 %v402_v20, %v400_v19  ;;  %v405_v26 = vsel %vm397_vm2, %v403_v17, %v404_v18  ;;  %v408_v32 = vrot.slane %v7670_v22, 1  ;;  %v409_v33 = vrot.slane %v7673_v23, 1  ;;  %v7696_v35 = vld [vmem:[%s7638_s21 + $0x60] sm:$0xff]  ;;  %v7699_v36 = vld [vmem:[%s7638_s21 + $0x68] sm:$0xff]  ;;  %v7702_v37 = vld [vmem:[%s7638_s21 + $0x78] sm:$0xff]  ;;  %s7470_s17 = sshll.u32 %s7534_s16, 4  ;;  %s7471_s17 = int_to_ptr.vmem [resolvable:$false] %s7470_s17 }
  0x21   : > { %v407_v31 = vsel %vm397_vm2, %v404_v18, %v406_v21  ;;  %v411_v34 = vrot.slane %v7676_v24, 1  ;;  %v413_v39 = vrot.slane %v7680_v27, 1  ;;  %v414_v40 = vrot.slane %v7683_v28, 1  ;;  %v7711_v42 = vld [vmem:[%s7638_s21 + $0x70] sm:$0x3]  ;;  %v7714_v43 = vld [vmem:[%s7638_s21 + $0x80] sm:$0xff]  ;;  %p7469_p13 = pneg %p7468_p12  ;;  %p7473_p0 = scmp.lt.s32.totalorder %s9090_s8, %s7471_s17 }
  0x22   : > { %6281 = vmatprep.mubr.msk.bf16.mxu0 %vm528_vm3, %v510_v25  ;;  %v7705_v38 = vpack.c.bf16 %v407_v31, %v405_v26  ;;  %v416_v41 = vrot.slane %v7686_v29, 1  ;;  %v410_v44 = vsel %vm397_vm2, %v408_v32, %v409_v33  ;;  %v418_v46 = vrot.slane %v7696_v35, 1  ;;  %v7721_v48 = vld [vmem:[%s7638_s21 + $0x88] sm:$0x3]  ;;  %v7724_v49 = vld [vmem:[%s7638_s21 + $0x90] sm:$0xff]  ;;  %v7727_v50 = vld [vmem:[%s7638_s21 + $0x98] sm:$0xff] }
  0x23   : > { %v412_v45 = vsel %vm397_vm2, %v409_v33, %v411_v34  ;;  %v419_v47 = vrot.slane %v7699_v36, 1  ;;  %v415_v52 = vsel %vm397_vm2, %v413_v39, %v414_v40  ;;  %v421_v53 = vrot.slane %v7711_v42, 1  ;;  %v7736_v54 = vld [vmem:[%s7638_s21 + $0xa0] sm:$0x3]  ;;  %v7749_v63 = vld [vmem:[%s7638_s21 + $0xa8] sm:$0xff]  ;;  %v7754_v1 = vld [vmem:[%s7638_s21 + $0xb0] sm:$0xff] }
  0x24   : > { %9170 = vst [vmem:[#allocation8_spill] sm:$0xff] %v7705_v38  ;;  %6282 = vmatmul.mubr.msk.bf16.vlgmr.msra.gmra.mrb[0].mxu0 %vm528_vm3, %v7705_v38  ;;  %v7731_v51 = vpack.c.bf16 %v412_v45, %v410_v44  ;;  %v417_v55 = vsel %vm397_vm2, %v414_v40, %v416_v41  ;;  %v423_v57 = vrot.slane %v7702_v37, 1  ;;  %v424_v58 = vrot.slane %v7714_v43, 1  ;;  %v7757_v2 = vld [vmem:[%s7638_s21 + $0xb8] sm:$0x3]  ;;  %v7760_v3 = vld [vmem:[%s7638_s21 + $0xc0] sm:$0xff] }
  0x25   : > { %v420_v56 = vsel %vm397_vm2, %v418_v46, %v419_v47  ;;  %6314 = vmatpush3.bf16.msra.mxu0 %v794_v6  ;;  %v422_v59 = vsel %vm397_vm2, %v419_v47, %v421_v53  ;;  %v426_v60 = vrot.slane %v7721_v48, 1  ;;  %v428_v61 = vrot.slane %v7724_v49, 1  ;;  %v7766_v7 = vld [vmem:[%s7638_s21 + $0xc8] sm:$0xff]  ;;  %v7769_v11 = vld [vmem:[%s7638_s21 + $0xd0] sm:$0x3]  ;;  %v7772_v12 = vld [vmem:[%s7638_s21 + $0xd8] sm:$0xff] }
  0x26   : > { %9171 = vst [vmem:[#allocation9_spill] sm:$0xff] %v7731_v51  ;;  %6285 = vmatprep.mubr.msk.bf16.mxu0 %vm528_vm3, %v7731_v51  ;;  %v429_v62 = vrot.slane %v7727_v50, 1  ;;  %6347 = vmatprep.subr.bf16.mxu0 %v7689_v30  ;;  %v431_v0 = vrot.slane %v7736_v54, 1  ;;  %v7763_v6 = vpack.c.bf16 %v417_v55, %v415_v52  ;;  %v7776_v18 = vpack.c.bf16 %v422_v59, %v420_v56  ;;  %v7780_v20 = vld [vmem:[%s7638_s21 + $0xe0] sm:$0xff]  ;;  %v7783_v21 = vld [vmem:[%s7638_s21 + $0xe8] sm:$0x3] }
  0x27   : > { %v425_v19 = vsel %vm397_vm2, %v423_v57, %v424_v58  ;;  %v7786_v25 = vld [vmem:[%s7638_s21 + $0xf0] sm:$0xff]  ;;  %v427_v26 = vsel %vm397_vm2, %v424_v58, %v426_v60  ;;  %v433_v32 = vrot.slane %v7749_v63, 1  ;;  %v434_v33 = vrot.slane %v7754_v1, 1  ;;  %v7793_v34 = vld [vmem:[%s7638_s21 + $0xf8] sm:$0xff]  ;;  %v7796_v39 = vld [vmem:[%s7638_s21 + $0x100] sm:$0x3] }
  0x28   : > { %9172 = vst [vmem:[#allocation10_spill] sm:$0xff] %v7763_v6  ;;  %9173 = vst [vmem:[#allocation11_spill] sm:$0xff] %v7776_v18  ;;  %v430_v31 = vsel %vm397_vm2, %v428_v61, %v429_v62  ;;  %v7799_v40 = vld [vmem:[%s7638_s21 + $0x108] sm:$0xff]  ;;  %v432_v41 = vsel %vm397_vm2, %v429_v62, %v431_v0  ;;  %v436_v44 = vrot.slane %v7757_v2, 1  ;;  %v438_v45 = vrot.slane %v7760_v3, 1  ;;  %v7806_v47 = vld [vmem:[%s7638_s21 + $0x110] sm:$0xff] }
  0x29   : > { %9174 = vst [vmem:[#allocation12_spill] sm:$0xff] %v7796_v39  ;;  %v439_v46 = vrot.slane %v7766_v7, 1  ;;  %v7809_v52 = vld [vmem:[%s7638_s21 + $0x118] sm:$0x3]  ;;  %v441_v53 = vrot.slane %v7769_v11, 1  ;;  %v443_v55 = vrot.slane %v7772_v12, 1  ;;  %v7831_v13 = vpack.c.bf16 %v427_v26, %v425_v19 }
  0x2a   : > { %9175 = vst [vmem:[#allocation13_spill] sm:$0xff] %v7809_v52  ;;  %v444_v56 = vrot.slane %v7780_v20, 1  ;;  %v446_v57 = vrot.slane %v7783_v21, 1  ;;  %v448_v58 = vrot.slane %v7786_v25, 1  ;;  %v449_v59 = vrot.slane %v7793_v34, 1  ;;  %v7824_v62 = vld [vmem:[%s7638_s21 + $0x120] sm:$0xff] }
  0x2b   : > { %v451_v60 = vrot.slane %v7796_v39, 1  ;;  %v453_v61 = vrot.slane %v7799_v40, 1  ;;  %v7827_v0 = vld [vmem:[%s7638_s21 + $0x128] sm:$0xff]  ;;  %v454_v17 = vrot.slane %v7806_v47, 1  ;;  %v456_v5 = vrot.slane %v7809_v52, 1  ;;  %9176 = vst [vmem:[#allocation14_spill] sm:$0xff] %v7831_v13 }
  0x2c   : > { %6286 = vmatmul.mubr.msk.bf16.gmra.mrb[4].mxu0 %vm528_vm3, %v7763_v6  ;;  %v7833_v6 = vpack.c.bf16 %v432_v41, %v430_v31  ;;  %v7837_v51 = vld [vmem:[%s7638_s21 + $0x130] sm:$0x3]  ;;  %v437_v38 = vsel %vm397_vm2, %v434_v33, %v436_v44  ;;  %v440_v30 = vsel %vm397_vm2, %v438_v45, %v439_v46  ;;  %v442_v4 = vsel %vm397_vm2, %v439_v46, %v441_v53  ;;  %v7854_v53 = vld [vmem:[%s7638_s21 + $0x138] sm:$0xff]  ;;  %s7472_s18 = scalar_lea.vmem %s7471_s17, 32 }
  0x2d   : > { %6289 = vmatprep.mubr.msk.bf16.mxu0 %vm528_vm3, %v7776_v18  ;;  %v435_v18 = vsel %vm397_vm2, %v433_v32, %v434_v33  ;;  %v445_v39 = vsel %vm397_vm2, %v443_v55, %v444_v56  ;;  %v447_v19 = vsel %vm397_vm2, %v444_v56, %v446_v57  ;;  %v450_v26 = vsel %vm397_vm2, %v448_v58, %v449_v59  ;;  %v7857_v55 = vld [vmem:[%s7638_s21 + $0x140] sm:$0xff]  ;;  %p7474_p1 = scmp.lt.s32.totalorder %s7472_s18, %s7466_s28 }
  0x2e   : > { %9177 = vst [vmem:[#allocation15_spill] sm:$0xff] %v7833_v6  ;;  %v458_v31 = vrot.slane %v7824_v62, 1  ;;  %v459_v32 = vrot.slane %v7827_v0, 1  ;;  %v452_v41 = vsel %vm397_vm2, %v449_v59, %v451_v60  ;;  %v455_v52 = vsel %vm397_vm2, %v453_v61, %v454_v17 }
  0x2f   : > { %v457_v33 = vsel %vm397_vm2, %v454_v17, %v456_v5  ;;  %v461_v44 = vrot.slane %v7837_v51, 1  ;;  %v963_v45 = vrot.slane %v7656_v14, 2  ;;  %v964_v46 = vrot.slane %v7659_v15, 2  ;;  %v7869_v17 = vld [vmem:[%s7638_s21 + $0x148] sm:$0x3]  ;;  %p7475_p2 = por %p7474_p1, %p7473_p0 }
  0x30   : > { %v966_v56 = vrot.slane %v7662_v16, 2  ;;  %v7862_v57 = vpack.c.bf16 %v437_v38, %v435_v18  ;;  %v7864_v58 = vpack.c.bf16 %v442_v4, %v440_v30  ;;  %v7866_v5 = vpack.c.bf16 %v447_v19, %v445_v39  ;;  %v7907_v19 = vld [vmem:[%s7638_s21 + $0x150] sm:$0xff] }
  0x31   : > { %v7873_v59 = vpack.c.bf16 %v452_v41, %v450_v26  ;;  %v7875_v60 = vpack.c.bf16 %v457_v33, %v455_v52  ;;  %v7878_v16 = vsel %vm397_vm2, %v458_v31, %v459_v32  ;;  %v7882_v4 = vpack.c.bf16 %v7659_v15, %v7656_v14  ;;  %v7926_v33 = vld [vmem:[%s7638_s21 + $0x158] sm:$0xff]  ;;  %v7932_v52 = vld [vmem:[%s7638_s21 + $0x170] sm:$0xff]  ;;  %p7476_p3 = pnand %p7475_p2, %p7469_p13 }
  0x32   : > { %v7885_v30 = vsel %vm397_vm2, %v459_v32, %v461_v44  ;;  %v7891_v39 = vpack.c.bf16 %v7673_v23, %v7670_v22  ;;  %v7896_v61 = vpack.c.bf16 %v7683_v28, %v7680_v27  ;;  %v7900_v14 = vpack.c.bf16 %v7699_v36, %v7696_v35  ;;  %v7929_v44 = vld [vmem:[%s7638_s21 + $0x168] sm:$0xff] }
  0x33   : > { %v7904_v15 = vpack.c.bf16 %v7714_v43, %v7702_v37  ;;  %v7911_v26 = vpack.c.bf16 %v7727_v50, %v7724_v49  ;;  %v7915_v31 = vpack.c.bf16 %v7754_v1, %v7749_v63  ;;  %v7919_v32 = vpack.c.bf16 %v7766_v7, %v7760_v3 }
  0x34   : > { %6290 = vmatmul.mubr.msk.bf16.gmra.mrb[8].mxu0 %vm528_vm3, %v7831_v13  ;;  %9178 = vst [vmem:[#allocation16_spill] sm:$0xff] %v7900_v14  ;;  %v7923_v41 = vpack.c.bf16 %v7780_v20, %v7772_v12  ;;  %v7936_v38 = vpack.c.bf16 %v7793_v34, %v7786_v25  ;;  %v7940_v18 = vpack.c.bf16 %v7806_v47, %v7799_v40  ;;  %v968_v14 = vrot.slane %v7670_v22, 2 }
  0x35   : > { %6293 = vmatprep.mubr.msk.bf16.mxu0 %vm528_vm3, %v7833_v6  ;;  %9179 = vst [vmem:[#allocation17_spill] sm:$0xff] %v7904_v15  ;;  %9180 = vst [vmem:[#allocation18_spill] sm:$0xff] %v7911_v26  ;;  %v7944_v6 = vpack.c.bf16 %v7827_v0, %v7824_v62  ;;  %v7948_v13 = vpack.c.bf16 %v7857_v55, %v7854_v53  ;;  %v965_v15 = vsel %vm957_vm4, %v963_v45, %v964_v46 }
  0x36   : > { %9181 = vst [vmem:[#allocation19_spill] sm:$0xff] %v7915_v31  ;;  %9182 = vst [vmem:[#allocation20_spill] sm:$0xff] %v7919_v32  ;;  %v7956_v32 = vpack.c.bf16 %v7932_v52, %v7929_v44  ;;  %v974_v45 = vrot.slane %v7683_v28, 2  ;;  %v978_v22 = vrot.slane %v7696_v35, 2 }
  0x37   : > { %9183 = vst [vmem:[#allocation21_spill] sm:$0xff] %v7923_v41  ;;  %9184 = vst [vmem:[#allocation22_spill] sm:$0xff] %v7936_v38  ;;  %v7952_v41 = vpack.c.bf16 %v7926_v33, %v7907_v19  ;;  %v9190_v38 = vrot.slane %v7647_v9, 2 }
  0x38   : > { %9185 = vst [vmem:[#allocation23_spill] sm:$0xff] %v7940_v18  ;;  %9186 = vst [vmem:[#allocation24_spill] sm:$0xff] %v7944_v6  ;;  %v9191_v18 = vrot.slane %v7644_v8, 2  ;;  %v9192_v6 = vrot.slane %v7650_v10, 2  ;;  %v969_v10 = vrot.slane %v7673_v23, 2  ;;  %v981_v23 = vrot.slane %v7711_v42, 2 }
  0x39   : > { %9187 = vst [vmem:[#allocation25_spill] sm:$0xff] %v7948_v13  ;;  %9188 = vst [vmem:[#allocation26_spill] sm:$0xff] %v7952_v41  ;;  %v9193_v26 = vmov %v9190_v38  ;;  %v989_v42 = vrot.slane %v7727_v50, 2 }
  0x3a   : > { %9189 = vst [vmem:[#allocation27_spill] sm:$0xff] %v7956_v32  ;;  %v7963_v31 = vsel %vm957_vm4, %v9191_v18, %v9190_v38  ;;  %v7970_v13 = vsel %vm957_vm4, %v9193_v26, %v9192_v6  ;;  %v967_v32 = vsel %vm957_vm4, %v964_v46, %v966_v56  ;;  %v971_v18 = vrot.slane %v7676_v24, 2 }
  0x3b   : > { %v7979_v38 = vpack.c.bf16 %v967_v32, %v965_v15  ;;  %v973_v6 = vrot.slane %v7680_v27, 2  ;;  %v976_v46 = vrot.slane %v7686_v29, 2  ;;  %v979_v56 = vrot.slane %v7699_v36, 2 }
  0x3c   : > { %6294 = vmatmul.mubr.msk.bf16.gmra.mrb[12].mxu0 %vm528_vm3, %v7862_v57  ;;  %v970_v15 = vsel %vm957_vm4, %v968_v14, %v969_v10  ;;  %v972_v26 = vsel %vm957_vm4, %v969_v10, %v971_v18  ;;  %v983_v24 = vrot.slane %v7702_v37, 2  ;;  %v984_v36 = vrot.slane %v7714_v43, 2 }
  0x3d   : > { %6297 = vmatprep.mubr.msk.bf16.mxu0 %vm528_vm3, %v7864_v58  ;;  %v7994_v27 = vpack.c.bf16 %v972_v26, %v970_v15  ;;  %v975_v32 = vsel %vm957_vm4, %v973_v6, %v974_v45  ;;  %v977_v28 = vsel %vm957_vm4, %v974_v45, %v976_v46  ;;  %v980_v29 = vsel %vm957_vm4, %v978_v22, %v979_v56 }
  0x3e   : > { %v7999_v41 = vpack.c.bf16 %v977_v28, %v975_v32  ;;  %v982_v35 = vsel %vm957_vm4, %v979_v56, %v981_v23  ;;  %v986_v14 = vrot.slane %v7721_v48, 2  ;;  %v988_v37 = vrot.slane %v7724_v49, 2  ;;  %v322_v28 = vld [vmem:[%s7638_s21 + $0x160] sm:$0x3] }
  0x3f   : > { %v8004_v10 = vpack.c.bf16 %v982_v35, %v980_v29  ;;  %v991_v18 = vrot.slane %v7736_v54, 2  ;;  %v985_v6 = vsel %vm957_vm4, %v983_v24, %v984_v36  ;;  %v993_v46 = vrot.slane %v7749_v63, 2 }
  0x40   : > { %v987_v45 = vsel %vm957_vm4, %v984_v36, %v986_v14  ;;  %v994_v22 = vrot.slane %v7754_v1, 2  ;;  %v990_v43 = vsel %vm957_vm4, %v988_v37, %v989_v42  ;;  %v996_v49 = vrot.slane %v7757_v2, 2 }
  0x41   : > { %v8013_v56 = vpack.c.bf16 %v987_v45, %v985_v6  ;;  %v992_v48 = vsel %vm957_vm4, %v989_v42, %v991_v18  ;;  %v998_v63 = vrot.slane %v7760_v3, 2  ;;  %v999_v1 = vrot.slane %v7766_v7, 2  ;;  %v9195_v18 = vld [vmem:[#allocation13_spill] sm:$0xff] }
  0x42   : > { %v8020_v50 = vpack.c.bf16 %v992_v48, %v990_v43  ;;  %v995_v54 = vsel %vm957_vm4, %v993_v46, %v994_v22  ;;  %v997_v15 = vsel %vm957_vm4, %v994_v22, %v996_v49  ;;  %v1001_v26 = vrot.slane %v7769_v11, 2 }
  0x43   : > { %v1003_v2 = vrot.slane %v7772_v12, 2  ;;  %v1004_v23 = vrot.slane %v7780_v20, 2  ;;  %v8033_v24 = vpack.c.bf16 %v7885_v30, %v7878_v16  ;;  %v8035_v32 = vpack.c.bf16 %v997_v15, %v995_v54  ;;  %v9194_v30 = vld [vmem:[#allocation12_spill] sm:$0xff] }
  0x44   : > { %6298 = vmatmul.mubr.msk.bf16.gmra.mrb[16].mxu0 %vm528_vm3, %v7866_v5  ;;  %v1000_v3 = vsel %vm957_vm4, %v998_v63, %v999_v1  ;;  %v1006_v7 = vrot.slane %v7783_v21, 2  ;;  %v1002_v29 = vsel %vm957_vm4, %v999_v1, %v1001_v26  ;;  %v1008_v11 = vrot.slane %v7786_v25, 2 }
  0x45   : > { %6301 = vmatprep.mubr.msk.bf16.mxu0 %vm528_vm3, %v7873_v59  ;;  %v1005_v35 = vsel %vm957_vm4, %v1003_v2, %v1004_v23  ;;  %v1009_v12 = vrot.slane %v7793_v34, 2  ;;  %v8044_v20 = vpack.c.bf16 %v1002_v29, %v1000_v3  ;;  %v1011_v36 = vrot.slane %v9194_v30, 2 }
  0x46   : > { %v1007_v16 = vsel %vm957_vm4, %v1004_v23, %v1006_v7  ;;  %v1013_v14 = vrot.slane %v7799_v40, 2  ;;  %v1014_v42 = vrot.slane %v7806_v47, 2  ;;  %v1016_v6 = vrot.slane %v9195_v18, 2 }
  0x47   : > { %v8049_v37 = vpack.c.bf16 %v1007_v16, %v1005_v35  ;;  %v1010_v21 = vsel %vm957_vm4, %v1008_v11, %v1009_v12  ;;  %v468_v25 = vrot.slane %v7907_v19, 1  ;;  %v469_v34 = vrot.slane %v7926_v33, 1 }
  0x48   : > { %v471_v45 = vrot.slane %v322_v28, 1  ;;  %v1012_v46 = vsel %vm957_vm4, %v1009_v12, %v1011_v36  ;;  %v9196_v22 = vrot.slane %v7857_v55, 1  ;;  %v9197_v43 = vrot.slane %v7854_v53, 1 }
  0x49   : > { %v8062_v48 = vpack.c.bf16 %v1012_v46, %v1010_v21  ;;  %v1015_v47 = vsel %vm957_vm4, %v1013_v14, %v1014_v42  ;;  %v1017_v49 = vsel %vm957_vm4, %v1014_v42, %v1016_v6  ;;  %v1018_v63 = vrot.slane %v7824_v62, 2 }
  0x4a   : > { %v465_v40 = vsel %vm397_vm2, %v9197_v43, %v9196_v22  ;;  %v8068_v54 = vpack.c.bf16 %v1017_v49, %v1015_v47  ;;  %v1019_v1 = vrot.slane %v7827_v0, 2  ;;  %v1021_v15 = vrot.slane %v7837_v51, 2  ;;  %v325_v51 = vld [vmem:[%s7638_s21 + $0x178] sm:$0x3] }
  0x4b   : > { %v9198_v26 = vrot.slane %v7869_v17, 1  ;;  %v9199_v2 = vmov %v9196_v22  ;;  %v1023_v3 = vrot.slane %v7854_v53, 2  ;;  %v1024_v7 = vrot.slane %v7857_v55, 2 }
  0x4c   : > { %6302 = vmatmul.mubr.msk.bf16.gmra.mrb[20].mxu0 %vm528_vm3, %v7875_v60  ;;  %v1026_v29 = vrot.slane %v7869_v17, 2  ;;  %v470_v62 = vsel %vm397_vm2, %v468_v25, %v469_v34  ;;  %v472_v0 = vsel %vm397_vm2, %v469_v34, %v471_v45  ;;  %v1020_v35 = vsel %vm957_vm4, %v1018_v63, %v1019_v1  ;;  %v9200_v63 = vld [vmem:[#allocation6_spill] sm:$0xff] }
  0x4d   : > { %6305 = vmatprep.mubr.msk.bf16.mxu0 %vm528_vm3, %v8033_v24  ;;  %v467_v23 = vsel %vm397_vm2, %v9199_v2, %v9198_v26  ;;  %v1022_v11 = vsel %vm957_vm4, %v1019_v1, %v1021_v15  ;;  %v1025_v16 = vsel %vm957_vm4, %v1023_v3, %v1024_v7  ;;  %v473_v55 = vrot.slane %v7929_v44, 1  ;;  %v9201_v15 = vld [vmem:[#allocation7_spill] sm:$0xff]  ;;  %v9204_v26 = vld [vmem:[#allocation18_spill] sm:$0xff]  ;;  %v9207_v3 = vld [vmem:[#allocation21_spill] sm:$0xff] }
  0x4e   : > { %v8088_v12 = vpack.c.bf16 %v1022_v11, %v1020_v35  ;;  %v1027_v30 = vsel %vm957_vm4, %v1024_v7, %v1026_v29  ;;  %v8092_v53 = vpack.c.bf16 %v467_v23, %v465_v40  ;;  %v474_v17 = vrot.slane %v7932_v52, 1  ;;  %v9205_v2 = vld [vmem:[#allocation19_spill] sm:$0xff]  ;;  %v9206_v23 = vld [vmem:[#allocation20_spill] sm:$0xff]  ;;  %v9208_v7 = vld [vmem:[#allocation22_spill] sm:$0xff] }
  0x4f   : > { %v8096_v36 = vpack.c.bf16 %v1027_v30, %v1025_v16  ;;  %v8098_v14 = vpack.c.bf16 %v472_v0, %v470_v62  ;;  %v476_v21 = vrot.slane %v325_v51, 1  ;;  %v1028_v18 = vrot.slane %v7907_v19, 2  ;;  %v9209_v29 = vld [vmem:[#allocation23_spill] sm:$0xff]  ;;  %v9210_v62 = vld [vmem:[#allocation24_spill] sm:$0xff]  ;;  %v9211_v0 = vld [vmem:[#allocation25_spill] sm:$0xff] }
  0x50   : > { %v475_v42 = vsel %vm397_vm2, %v473_v55, %v474_v17  ;;  %v1029_v6 = vrot.slane %v7926_v33, 2  ;;  %v1031_v25 = vrot.slane %v322_v28, 2  ;;  %v1033_v45 = vrot.slane %v7929_v44, 2  ;;  %v9213_v35 = vld [vmem:[#allocation27_spill] sm:$0xff]  ;;  %v5686_v16 = vld [vmem:[%s9131_s1 + $0x8] sm:$0x3] }
  0x51   : > { %v477_v34 = vsel %vm397_vm2, %v474_v17, %v476_v21  ;;  %v1034_v46 = vrot.slane %v7932_v52, 2  ;;  %v1036_v22 = vrot.slane %v325_v51, 2  ;;  %v332_v44 = vpack.c.bf16 %v7647_v9, %v7644_v8  ;;  %v5669_v52 = vld [vmem:[%s9131_s1 + $0x6] sm:$0x3]  ;;  %v9203_v9 = vld [vmem:[#allocation17_spill] sm:$0xff]  ;;  %v9212_v51 = vld [vmem:[#allocation26_spill] sm:$0xff] }
  0x52   : > { %v1030_v43 = vsel %vm957_vm4, %v1028_v18, %v1029_v6  ;;  %v1032_v40 = vsel %vm957_vm4, %v1029_v6, %v1031_v25  ;;  %v8116_v28 = vpack.c.bf16 %v477_v34, %v475_v42  ;;  %v1339_v1 = vand.u32 %v5669_v52, %v9200_v63  ;;  %v9202_v8 = vld [vmem:[#allocation16_spill] sm:$0xff]  ;;  %v328_v42 = vld [vmem:[%s7638_s21 + $0x190] sm:$0x3]  ;;  %v9220_v52 = vld [vmem:[#allocation15_spill] sm:$0xff] }
  0x53   : > { %v8112_v47 = vpack.c.bf16 %v1032_v40, %v1030_v43  ;;  %v1035_v19 = vsel %vm957_vm4, %v1033_v45, %v1034_v46  ;;  %v1037_v33 = vsel %vm957_vm4, %v1034_v46, %v1036_v22  ;;  %v9214_v11 = vpack.c.bf16 %v7970_v13, %v7963_v31  ;;  %v5703_v13 = vld [vmem:[%s9131_s1 + $0xa] sm:$0x3]  ;;  %v9215_v46 = vld [vmem:[#allocation8_spill] sm:$0xff]  ;;  %v5720_v22 = vld [vmem:[%s9131_s1 + $0xc] sm:$0x3] }
  0x54   : > { %6306 = vmatmul.mubr.msk.bf16.gmra.mrb[24].mxu0 %vm528_vm3, %v8092_v53  ;;  %v8118_v49 = vpack.c.bf16 %v1037_v33, %v1035_v19  ;;  %v1551_v30 = vand.u32 %v5686_v16, %v9200_v63  ;;  %v1760_v31 = vand.u32 %v5703_v13, %v9200_v63  ;;  %v327_v55 = vld [vmem:[%s7638_s21 + $0x188] sm:$0xff]  ;;  %v1749_v6 = vrot.slane %v328_v42, 2  ;;  %v9217_v19 = vld [vmem:[#allocation10_spill] sm:$0xff]  ;;  %v9218_v33 = vld [vmem:[#allocation11_spill] sm:$0xff] }
  0x55   : > { %6309 = vmatprep.mubr.msk.bf16.mxu0 %vm528_vm3, %v8098_v14  ;;  %v1747_v21 = vrot.slane %v327_v55, 2  ;;  %v1962_v43 = vand.u32 %v5720_v22, %v9200_v63  ;;  %v9216_v40 = vld [vmem:[#allocation9_spill] sm:$0xff] }
  0x57   : > { %v1750_v25 = vsel %vm957_vm4, %v1747_v21, %v1749_v6 }
  0x5c   : > { %6310 = vmatmul.mubr.msk.bf16.gmra.mrb[28].mxu0 %vm528_vm3, %v8116_v28 }
  0x5d   : > { %6315 = vmatprep.mubr.msk.bf16.mxu0 %vm528_vm3, %v332_v44  ;;  %v9219_v44 = vld [vmem:[#allocation14_spill] sm:$0xff] }
  0x64   : > { %6316 = vmatmul.mubr.msk.bf16.vlgmr.msra.gmra.mrb[0].mxu0 %vm528_vm3, %v7882_v4 }
  0x65   : > { %6319 = vmatprep.mubr.msk.bf16.mxu0 %vm528_vm3, %v7891_v39  ;;  %6348 = vmatpush3.bf16.msra.mxu0 %v9201_v15  ;;  %v1538_v15 = vrot.slane %v327_v55, 1 }
  0x66   : > { %6381 = vmatprep.subr.bf16.mxu0 %v1339_v1 }
  0x6c   : > { %6320 = vmatmul.mubr.msk.bf16.gmra.mrb[4].mxu0 %vm528_vm3, %v7896_v61 }
  0x6d   : > { %6323 = vmatprep.mubr.msk.bf16.mxu0 %vm528_vm3, %v9202_v8 }
  0x74   : > { %6324 = vmatmul.mubr.msk.bf16.gmra.mrb[8].mxu0 %vm528_vm3, %v9203_v9 }
  0x75   : > { %6327 = vmatprep.mubr.msk.bf16.mxu0 %vm528_vm3, %v9204_v26 }
  0x7c   : > { %6328 = vmatmul.mubr.msk.bf16.gmra.mrb[12].mxu0 %vm528_vm3, %v9205_v2 }
  0x7d   : > { %6331 = vmatprep.mubr.msk.bf16.mxu0 %vm528_vm3, %v9206_v23 }
  0x84   : > { %6332 = vmatmul.mubr.msk.bf16.gmra.mrb[16].mxu0 %vm528_vm3, %v9207_v3 }
  0x85   : > { %6335 = vmatprep.mubr.msk.bf16.mxu0 %vm528_vm3, %v9208_v7 }
  0x8c   : > { %6336 = vmatmul.mubr.msk.bf16.gmra.mrb[20].mxu0 %vm528_vm3, %v9209_v29 }
  0x8d   : > { %6339 = vmatprep.mubr.msk.bf16.mxu0 %vm528_vm3, %v9210_v62 }
  0x94   : > { %6340 = vmatmul.mubr.msk.bf16.gmra.mrb[24].mxu0 %vm528_vm3, %v9211_v0 }
  0x95   : > { %6343 = vmatprep.mubr.msk.bf16.mxu0 %vm528_vm3, %v9212_v51 }
  0x9c   : > { %6344 = vmatmul.mubr.msk.bf16.gmra.mrb[28].mxu0 %vm528_vm3, %v9213_v35 }
  0x9d   : > { %6349 = vmatprep.mubr.msk.bf16.mxu0 %vm528_vm3, %v9214_v11  ;;  %v1540_v11 = vrot.slane %v328_v42, 1 }
  0xa4   : > { %6350 = vmatmul.mubr.msk.bf16.vlgmr.msra.gmra.mrb[0].mxu0 %vm528_vm3, %v7979_v38 }
  0xa5   : > { %6353 = vmatprep.mubr.msk.bf16.mxu0 %vm528_vm3, %v7994_v27  ;;  %6382 = vmatpush3.bf16.msra.mxu0 %v1339_v1 }
  0xa6   : > { %6415 = vmatprep.subr.bf16.mxu0 %v1551_v30 }
  0xac   : > { %6354 = vmatmul.mubr.msk.bf16.gmra.mrb[4].mxu0 %vm528_vm3, %v7999_v41 }
  0xad   : > { %6357 = vmatprep.mubr.msk.bf16.mxu0 %vm528_vm3, %v8004_v10 }
  0xb4   : > { %6358 = vmatmul.mubr.msk.bf16.gmra.mrb[8].mxu0 %vm528_vm3, %v8013_v56 }
  0xb5   : > { %6361 = vmatprep.mubr.msk.bf16.mxu0 %vm528_vm3, %v8020_v50 }
  0xbc   : > { %6362 = vmatmul.mubr.msk.bf16.gmra.mrb[12].mxu0 %vm528_vm3, %v8035_v32 }
  0xbd   : > { %6365 = vmatprep.mubr.msk.bf16.mxu0 %vm528_vm3, %v8044_v20 }
  0xc4   : > { %6366 = vmatmul.mubr.msk.bf16.gmra.mrb[16].mxu0 %vm528_vm3, %v8049_v37 }
  0xc5   : > { %6369 = vmatprep.mubr.msk.bf16.mxu0 %vm528_vm3, %v8062_v48 }
  0xcc   : > { %6370 = vmatmul.mubr.msk.bf16.gmra.mrb[20].mxu0 %vm528_vm3, %v8068_v54 }
  0xcd   : > { %6373 = vmatprep.mubr.msk.bf16.mxu0 %vm528_vm3, %v8088_v12 }
  0xd4   : > { %6374 = vmatmul.mubr.msk.bf16.gmra.mrb[24].mxu0 %vm528_vm3, %v8096_v36 }
  0xd5   : > { %6377 = vmatprep.mubr.msk.bf16.mxu0 %vm528_vm3, %v8112_v47 }
  0xdc   : > { %6378 = vmatmul.mubr.msk.bf16.gmra.mrb[28].mxu0 %vm528_vm3, %v8118_v49 }
  0xdd   : > { %6383 = vmatprep.mubr.msk.bf16.mxu0 %vm528_vm3, %v7882_v4  ;;  %v326_v4 = vld [vmem:[%s7638_s21 + $0x180] sm:$0xff] }
  0xde   : > { %v1746_v17 = vrot.slane %v326_v4, 2  ;;  %v8237_v34 = vpack.c.bf16 %v327_v55, %v326_v4  ;;  %v1537_v1 = vrot.slane %v326_v4, 1 }
  0xe0   : > { %v1748_v18 = vsel %vm957_vm4, %v1746_v17, %v1747_v21  ;;  %v1539_v16 = vsel %vm397_vm2, %v1537_v1, %v1538_v15 }
  0xe1   : > { %v8239_v45 = vpack.c.bf16 %v1750_v25, %v1748_v18 }
  0xe4   : > { %6384 = vmatmul.mubr.msk.bf16.vlgmr.msra.gmra.mrb[0].mxu0 %vm528_vm3, %v7891_v39 }
  0xe5   : > { %6387 = vmatprep.mubr.msk.bf16.mxu0 %vm528_vm3, %v7896_v61  ;;  %6416 = vmatpush3.bf16.msra.mxu0 %v1551_v30  ;;  %v1541_v30 = vsel %vm397_vm2, %v1538_v15, %v1540_v11 }
  0xe6   : > { %6449 = vmatprep.subr.bf16.mxu0 %v1760_v31  ;;  %v8279_v13 = vpack.c.bf16 %v1541_v30, %v1539_v16 }
  0xec   : > { %6388 = vmatmul.mubr.msk.bf16.gmra.mrb[4].mxu0 %vm528_vm3, %v9202_v8 }
  0xed   : > { %6391 = vmatprep.mubr.msk.bf16.mxu0 %vm528_vm3, %v9203_v9 }
  0xf4   : > { %6392 = vmatmul.mubr.msk.bf16.gmra.mrb[8].mxu0 %vm528_vm3, %v9204_v26 }
  0xf5   : > { %6395 = vmatprep.mubr.msk.bf16.mxu0 %vm528_vm3, %v9205_v2 }
  0xfc   : > { %6396 = vmatmul.mubr.msk.bf16.gmra.mrb[12].mxu0 %vm528_vm3, %v9206_v23 }
  0xfd   : > { %6399 = vmatprep.mubr.msk.bf16.mxu0 %vm528_vm3, %v9207_v3 }
 0x104   : > { %6400 = vmatmul.mubr.msk.bf16.gmra.mrb[16].mxu0 %vm528_vm3, %v9208_v7 }
 0x105   : > { %6403 = vmatprep.mubr.msk.bf16.mxu0 %vm528_vm3, %v9209_v29 }
 0x10c   : > { %6404 = vmatmul.mubr.msk.bf16.gmra.mrb[20].mxu0 %vm528_vm3, %v9210_v62 }
 0x10d   : > { %6407 = vmatprep.mubr.msk.bf16.mxu0 %vm528_vm3, %v9211_v0 }
 0x114   : > { %6408 = vmatmul.mubr.msk.bf16.gmra.mrb[24].mxu0 %vm528_vm3, %v9212_v51 }
 0x115   : > { %6411 = vmatprep.mubr.msk.bf16.mxu0 %vm528_vm3, %v9213_v35 }
 0x11c   : > { %6412 = vmatmul.mubr.msk.bf16.gmra.mrb[28].mxu0 %vm528_vm3, %v8237_v34 }
 0x11d   : > { %6417 = vmatprep.mubr.msk.bf16.mxu0 %vm528_vm3, %v9215_v46 }
 0x124   : > { %6418 = vmatmul.mubr.msk.bf16.vlgmr.msra.gmra.mrb[0].mxu0 %vm528_vm3, %v9216_v40 }
 0x125   : > { %6421 = vmatprep.mubr.msk.bf16.mxu0 %vm528_vm3, %v9217_v19  ;;  %6450 = vmatpush3.bf16.msra.mxu0 %v1760_v31  ;;  %v5737_v31 = vld [vmem:[%s9131_s1 + $0xe] sm:$0x3] }
 0x126   : > { %6483 = vmatprep.subr.bf16.mxu0 %v1962_v43  ;;  %v2174_v4 = vand.u32 %v5737_v31, %v9200_v63 }
 0x12c   : > { %6422 = vmatmul.mubr.msk.bf16.gmra.mrb[4].mxu0 %vm528_vm3, %v9218_v33 }
 0x12d   : > { %6425 = vmatprep.mubr.msk.bf16.mxu0 %vm528_vm3, %v9219_v44 }
 0x134   : > { %6426 = vmatmul.mubr.msk.bf16.gmra.mrb[8].mxu0 %vm528_vm3, %v9220_v52 }
 0x135   : > { %6429 = vmatprep.mubr.msk.bf16.mxu0 %vm528_vm3, %v7862_v57 }
 0x13c   : > { %6430 = vmatmul.mubr.msk.bf16.gmra.mrb[12].mxu0 %vm528_vm3, %v7864_v58 }
 0x13d   : > { %6433 = vmatprep.mubr.msk.bf16.mxu0 %vm528_vm3, %v7866_v5 }
 0x144   : > { %6434 = vmatmul.mubr.msk.bf16.gmra.mrb[16].mxu0 %vm528_vm3, %v7873_v59 }
 0x145   : > { %6437 = vmatprep.mubr.msk.bf16.mxu0 %vm528_vm3, %v7875_v60 }
 0x14c   : > { %6438 = vmatmul.mubr.msk.bf16.gmra.mrb[20].mxu0 %vm528_vm3, %v8033_v24 }
 0x14d   : > { %6441 = vmatprep.mubr.msk.bf16.mxu0 %vm528_vm3, %v8092_v53 }
 0x154   : > { %6442 = vmatmul.mubr.msk.bf16.gmra.mrb[24].mxu0 %vm528_vm3, %v8098_v14 }
 0x155   : > { %6445 = vmatprep.mubr.msk.bf16.mxu0 %vm528_vm3, %v8116_v28 }
 0x15c   : > { %6446 = vmatmul.mubr.msk.bf16.gmra.mrb[28].mxu0 %vm528_vm3, %v8279_v13 }
 0x15d   : > { %6451 = vmatprep.mubr.msk.bf16.mxu0 %vm528_vm3, %v7979_v38  ;;  %v5754_v38 = vld [vmem:[%s9131_s1 + $0x10] sm:$0x3] }
 0x15e   : > { %v2383_v55 = vand.u32 %v5754_v38, %v9200_v63 }
 0x164   : > { %6452 = vmatmul.mubr.msk.bf16.vlgmr.msra.gmra.mrb[0].mxu0 %vm528_vm3, %v7994_v27 }
 0x165   : > { %6455 = vmatprep.mubr.msk.bf16.mxu0 %vm528_vm3, %v7999_v41  ;;  %6484 = vmatpush3.bf16.msra.mxu0 %v1962_v43 }
 0x166   : > { %6517 = vmatprep.subr.bf16.mxu0 %v2174_v4 }
 0x16c   : > { %6456 = vmatmul.mubr.msk.bf16.gmra.mrb[4].mxu0 %vm528_vm3, %v8004_v10 }
 0x16d   : > { %6459 = vmatprep.mubr.msk.bf16.mxu0 %vm528_vm3, %v8013_v56 }
 0x174   : > { %6460 = vmatmul.mubr.msk.bf16.gmra.mrb[8].mxu0 %vm528_vm3, %v8020_v50 }
 0x175   : > { %6463 = vmatprep.mubr.msk.bf16.mxu0 %vm528_vm3, %v8035_v32 }
 0x17c   : > { %6464 = vmatmul.mubr.msk.bf16.gmra.mrb[12].mxu0 %vm528_vm3, %v8044_v20 }
 0x17d   : > { %6467 = vmatprep.mubr.msk.bf16.mxu0 %vm528_vm3, %v8049_v37 }
 0x184   : > { %6468 = vmatmul.mubr.msk.bf16.gmra.mrb[16].mxu0 %vm528_vm3, %v8062_v48 }
 0x185   : > { %6471 = vmatprep.mubr.msk.bf16.mxu0 %vm528_vm3, %v8068_v54 }
 0x18c   : > { %6472 = vmatmul.mubr.msk.bf16.gmra.mrb[20].mxu0 %vm528_vm3, %v8088_v12 }
 0x18d   : > { %6475 = vmatprep.mubr.msk.bf16.mxu0 %vm528_vm3, %v8096_v36 }
 0x194   : > { %6476 = vmatmul.mubr.msk.bf16.gmra.mrb[24].mxu0 %vm528_vm3, %v8112_v47 }
 0x195   : > { %6479 = vmatprep.mubr.msk.bf16.mxu0 %vm528_vm3, %v8118_v49 }
 0x19c   : > { %6480 = vmatmul.mubr.msk.bf16.gmra.mrb[28].mxu0 %vm528_vm3, %v8239_v45 }
 0x19d   : > { %6485 = vmatprep.mubr.msk.bf16.mxu0 %vm528_vm3, %v7891_v39  ;;  %v329_v39 = vld [vmem:[%s7638_s21 + $0x198] sm:$0xff] }
 0x19e   : > { %v2369_v63 = vrot.slane %v329_v39, 2 }
 0x1a4   : > { %6486 = vmatmul.mubr.msk.bf16.vlgmr.msra.gmra.mrb[0].mxu0 %vm528_vm3, %v7896_v61  ;;  %v330_v61 = vld [vmem:[%s7638_s21 + $0x1a0] sm:$0xff] }
 0x1a5   : > { %6489 = vmatprep.mubr.msk.bf16.mxu0 %vm528_vm3, %v9202_v8  ;;  %6518 = vmatpush3.bf16.msra.mxu0 %v2174_v4  ;;  %v2370_v8 = vrot.slane %v330_v61, 2 }
 0x1a6   : > { %6551 = vmatprep.subr.bf16.mxu0 %v2383_v55 }
 0x1ac   : > { %6490 = vmatmul.mubr.msk.bf16.gmra.mrb[4].mxu0 %vm528_vm3, %v9203_v9  ;;  %v331_v9 = vld [vmem:[%s7638_s21 + $0x1a8] sm:$0x3] }
 0x1ad   : > { %6493 = vmatprep.mubr.msk.bf16.mxu0 %vm528_vm3, %v9204_v26  ;;  %v2371_v26 = vsel %vm957_vm4, %v2369_v63, %v2370_v8 }
 0x1b4   : > { %6494 = vmatmul.mubr.msk.bf16.gmra.mrb[8].mxu0 %vm528_vm3, %v9205_v2  ;;  %v2372_v2 = vrot.slane %v331_v9, 2 }
 0x1b5   : > { %6497 = vmatprep.mubr.msk.bf16.mxu0 %vm528_vm3, %v9206_v23 }
 0x1b6   : > { %v2373_v23 = vsel %vm957_vm4, %v2370_v8, %v2372_v2 }
 0x1bc   : > { %6498 = vmatmul.mubr.msk.bf16.gmra.mrb[12].mxu0 %vm528_vm3, %v9207_v3  ;;  %v1955_v3 = vpack.c.bf16 %v330_v61, %v329_v39 }
 0x1bd   : > { %6501 = vmatprep.mubr.msk.bf16.mxu0 %vm528_vm3, %v9208_v7  ;;  %v2376_v7 = vpack.c.bf16 %v2373_v23, %v2371_v26 }
 0x1c4   : > { %6502 = vmatmul.mubr.msk.bf16.gmra.mrb[16].mxu0 %vm528_vm3, %v9209_v29  ;;  %v2163_v29 = vrot.slane %v331_v9, 1 }
 0x1c5   : > { %6505 = vmatprep.mubr.msk.bf16.mxu0 %vm528_vm3, %v9210_v62 }
 0x1cc   : > { %6506 = vmatmul.mubr.msk.bf16.gmra.mrb[20].mxu0 %vm528_vm3, %v9211_v0 }
 0x1cd   : > { %6509 = vmatprep.mubr.msk.bf16.mxu0 %vm528_vm3, %v9212_v51 }
 0x1d4   : > { %6510 = vmatmul.mubr.msk.bf16.gmra.mrb[24].mxu0 %vm528_vm3, %v9213_v35 }
 0x1d5   : > { %6513 = vmatprep.mubr.msk.bf16.mxu0 %vm528_vm3, %v8237_v34 }
 0x1dc   : > { %6514 = vmatmul.mubr.msk.bf16.gmra.mrb[28].mxu0 %vm528_vm3, %v1955_v3 }
 0x1dd   : > { %6519 = vmatprep.mubr.msk.bf16.mxu0 %vm528_vm3, %v9216_v40 }
 0x1e4   : > { %6520 = vmatmul.mubr.msk.bf16.vlgmr.msra.gmra.mrb[0].mxu0 %vm528_vm3, %v9217_v19 }
 0x1e5   : > { %6523 = vmatprep.mubr.msk.bf16.mxu0 %vm528_vm3, %v9218_v33  ;;  %6552 = vmatpush3.bf16.msra.mxu0 %v2383_v55 }
 0x1ec   : > { %6524 = vmatmul.mubr.msk.bf16.gmra.mrb[4].mxu0 %vm528_vm3, %v9219_v44 }
 0x1ed   : > { %6527 = vmatprep.mubr.msk.bf16.mxu0 %vm528_vm3, %v9220_v52  ;;  %v8564_v52 = vld [vmem:[%s9133_s3 + $0x10] sm:$0xff]  }
 0x1f4   : > { %6528 = vmatmul.mubr.msk.bf16.gmra.mrb[8].mxu0 %vm528_vm3, %v7862_v57  ;;  %v2160_v57 = vrot.slane %v329_v39, 1 }
 0x1f5   : > { %6531 = vmatprep.mubr.msk.bf16.mxu0 %vm528_vm3, %v7864_v58  ;;  %v2161_v58 = vrot.slane %v330_v61, 1 }
 0x1fc   : > { %6532 = vmatmul.mubr.msk.bf16.gmra.mrb[12].mxu0 %vm528_vm3, %v7866_v5  ;;  %v2162_v5 = vsel %vm397_vm2, %v2160_v57, %v2161_v58 }
 0x1fd   : > { %6535 = vmatprep.mubr.msk.bf16.mxu0 %vm528_vm3, %v7873_v59  ;;  %v2164_v59 = vsel %vm397_vm2, %v2161_v58, %v2163_v29 }
 0x204   : > { %6536 = vmatmul.mubr.msk.bf16.gmra.mrb[16].mxu0 %vm528_vm3, %v7875_v60  ;;  %v2167_v60 = vpack.c.bf16 %v2164_v59, %v2162_v5 }
 0x205   : > { %6539 = vmatprep.mubr.msk.bf16.mxu0 %vm528_vm3, %v8033_v24  ;;  %v7456_v24 = vld [vmem:[%s9133_s3] sm:$0xff]  }
 0x20c   : > { %6540 = vmatmul.mubr.msk.bf16.gmra.mrb[20].mxu0 %vm528_vm3, %v8092_v53 }
 0x20d   : > { %6543 = vmatprep.mubr.msk.bf16.mxu0 %vm528_vm3, %v8098_v14 }
 0x214   : > { %6544 = vmatmul.mubr.msk.bf16.gmra.mrb[24].mxu0 %vm528_vm3, %v8116_v28 }
 0x215   : > { %6547 = vmatprep.mubr.msk.bf16.mxu0 %vm528_vm3, %v8279_v13 }
 0x21c   : > { %6548 = vmatmul.mubr.msk.bf16.gmra.mrb[28].mxu0 %vm528_vm3, %v2167_v60 }
 0x21d   : > { %6553 = vmatprep.mubr.msk.bf16.mxu0 %vm528_vm3, %v7994_v27  ;;  %v7455_v27 = vld [vmem:[%s9133_s3 + $0x8] sm:$0xff]  }
 0x21e   : > { %6585 = vmatprep.subr.bf16.mxu1 %v7455_v27 }
 0x21f   : > { %6586 = vmatpush3.bf16.msra.mxu1 %v7455_v27 }
 0x220   : > { %6619 = vmatprep.subr.bf16.mxu1 %v7456_v24 }
 0x224   : > { %6554 = vmatmul.mubr.msk.bf16.vlgmr.msra.gmra.mrb[0].mxu0 %vm528_vm3, %v7999_v41  ;;  %v7531_v41 = vmov 0.0  }
 0x225   : > { %6557 = vmatprep.mubr.msk.bf16.mxu0 %vm528_vm3, %v8004_v10  ;;  %2657 = vst.msk [vmem:[#allocation2 + $0x30] sm:$0xff] %vm2649_vm5, %v7531_v41  ;;  %2658 = vst.msk [vmem:[#allocation2 + $0x38] sm:$0xff] %vm2649_vm5, %v7531_v41 }
 0x226   : > { %2650 = vst.msk [vmem:[#allocation2] sm:$0xff] %vm2649_vm5, %v7531_v41  ;;  %2651 = vst.msk [vmem:[#allocation2 + $0x8] sm:$0xff] %vm2649_vm5, %v7531_v41 }
 0x227   : > { %2654 = vst.msk [vmem:[#allocation2 + $0x18] sm:$0xff] %vm2649_vm5, %v7531_v41  ;;  %2655 = vst.msk [vmem:[#allocation2 + $0x20] sm:$0xff] %vm2649_vm5, %v7531_v41 }
 0x228   : > { %2660 = vst.msk [vmem:[#allocation2 + $0x48] sm:$0xff] %vm2649_vm5, %v7531_v41  ;;  %2661 = vst.msk [vmem:[#allocation2 + $0x50] sm:$0xff] %vm2649_vm5, %v7531_v41 }
 0x229   : > { %2663 = vst.msk [vmem:[#allocation2 + $0x60] sm:$0xff] %vm2649_vm5, %v7531_v41  ;;  %2664 = vst.msk [vmem:[#allocation2 + $0x68] sm:$0xff] %vm2649_vm5, %v7531_v41 }
 0x22a   : > { %2666 = vst.msk [vmem:[#allocation2 + $0x78] sm:$0xff] %vm2649_vm5, %v7531_v41  ;;  %2667 = vst.msk [vmem:[#allocation2 + $0x80] sm:$0xff] %vm2649_vm5, %v7531_v41 }
 0x22b   : > { %2669 = vst.msk [vmem:[#allocation2 + $0x90] sm:$0xff] %vm2649_vm5, %v7531_v41  ;;  %2670 = vst.msk [vmem:[#allocation2 + $0x98] sm:$0xff] %vm2649_vm5, %v7531_v41 }
 0x22c   : > { %6558 = vmatmul.mubr.msk.bf16.gmra.mrb[4].mxu0 %vm528_vm3, %v8013_v56  ;;  %2672 = vst.msk [vmem:[#allocation2 + $0xa8] sm:$0xff] %vm2649_vm5, %v7531_v41  ;;  %2673 = vst.msk [vmem:[#allocation2 + $0xb0] sm:$0xff] %vm2649_vm5, %v7531_v41 }
 0x22d   : > { %6561 = vmatprep.mubr.msk.bf16.mxu0 %vm528_vm3, %v8020_v50  ;;  %2675 = vst.msk [vmem:[#allocation2 + $0xc0] sm:$0xff] %vm2649_vm5, %v7531_v41  ;;  %2676 = vst.msk [vmem:[#allocation2 + $0xc8] sm:$0xff] %vm2649_vm5, %v7531_v41  ;;  %v2788_v10 = vld [vmem:[#allocation2 + $0x1] sm:$0xff] }
 0x22e   : > { %2678 = vst.msk [vmem:[#allocation2 + $0xd8] sm:$0xff] %vm2649_vm5, %v7531_v41  ;;  %2679 = vst.msk [vmem:[#allocation2 + $0xe0] sm:$0xff] %vm2649_vm5, %v7531_v41 }
 0x22f   : > { %2681 = vst.msk [vmem:[#allocation2 + $0xf0] sm:$0xff] %vm2649_vm5, %v7531_v41  ;;  %2682 = vst.msk [vmem:[#allocation2 + $0xf8] sm:$0xff] %vm2649_vm5, %v7531_v41 }
 0x230   : > { %2684 = vst.msk [vmem:[#allocation2 + $0x108] sm:$0xff] %vm2649_vm5, %v7531_v41  ;;  %2685 = vst.msk [vmem:[#allocation2 + $0x110] sm:$0xff] %vm2649_vm5, %v7531_v41 }
 0x231   : > { %2687 = vst.msk [vmem:[#allocation2 + $0x120] sm:$0xff] %vm2649_vm5, %v7531_v41  ;;  %2688 = vst.msk [vmem:[#allocation2 + $0x128] sm:$0xff] %vm2649_vm5, %v7531_v41 }
 0x232   : > { %2690 = vst.msk [vmem:[#allocation2 + $0x138] sm:$0xff] %vm2649_vm5, %v7531_v41  ;;  %2691 = vst.msk [vmem:[#allocation2 + $0x140] sm:$0xff] %vm2649_vm5, %v7531_v41 }
 0x233   : > { %2693 = vst.msk [vmem:[#allocation2 + $0x150] sm:$0xff] %vm2649_vm5, %v7531_v41  ;;  %2694 = vst.msk [vmem:[#allocation2 + $0x158] sm:$0xff] %vm2649_vm5, %v7531_v41 }
 0x234   : > { %6562 = vmatmul.mubr.msk.bf16.gmra.mrb[8].mxu0 %vm528_vm3, %v8035_v32  ;;  %2696 = vst.msk [vmem:[#allocation2 + $0x168] sm:$0xff] %vm2649_vm5, %v7531_v41  ;;  %2697 = vst.msk [vmem:[#allocation2 + $0x170] sm:$0xff] %vm2649_vm5, %v7531_v41  ;;  %v8541_v32 = vld [vmem:[%s9132_s2] ss:$0 sm:$0xff] }
 0x235   : > { %6565 = vmatprep.mubr.msk.bf16.mxu0 %vm528_vm3, %v8044_v20  ;;  %2699 = vst.msk [vmem:[#allocation2 + $0x180] sm:$0xff] %vm2649_vm5, %v7531_v41  ;;  %2700 = vst.msk [vmem:[#allocation2 + $0x188] sm:$0xff] %vm2649_vm5, %v7531_v41 }
 0x236   : > { %2702 = vst.msk [vmem:[#allocation2 + $0x198] sm:$0xff] %vm2649_vm5, %v7531_v41  ;;  %2703 = vst.msk [vmem:[#allocation2 + $0x1a0] sm:$0xff] %vm2649_vm5, %v7531_v41 }
 0x237   : > { %2659 = vst.msk [vmem:[#allocation2 + $0x40] sm:$0x3] %vm2652_vm6, %v7531_v41  ;;  %2653 = vst.msk [vmem:[#allocation2 + $0x10] sm:$0x3] %vm2652_vm6, %v7531_v41 }
 0x238   : > { %2656 = vst.msk [vmem:[#allocation2 + $0x28] sm:$0x3] %vm2652_vm6, %v7531_v41  ;;  %2662 = vst.msk [vmem:[#allocation2 + $0x58] sm:$0x3] %vm2652_vm6, %v7531_v41 }
 0x239   : > { %2665 = vst.msk [vmem:[#allocation2 + $0x70] sm:$0x3] %vm2652_vm6, %v7531_v41  ;;  %2668 = vst.msk [vmem:[#allocation2 + $0x88] sm:$0x3] %vm2652_vm6, %v7531_v41 }
 0x23a   : > { %2671 = vst.msk [vmem:[#allocation2 + $0xa0] sm:$0x3] %vm2652_vm6, %v7531_v41  ;;  %2674 = vst.msk [vmem:[#allocation2 + $0xb8] sm:$0x3] %vm2652_vm6, %v7531_v41 }
 0x23b   : > { %2677 = vst.msk [vmem:[#allocation2 + $0xd0] sm:$0x3] %vm2652_vm6, %v7531_v41  ;;  %2680 = vst.msk [vmem:[#allocation2 + $0xe8] sm:$0x3] %vm2652_vm6, %v7531_v41 }
 0x23c   : > { %6566 = vmatmul.mubr.msk.bf16.gmra.mrb[12].mxu0 %vm528_vm3, %v8049_v37  ;;  %2683 = vst.msk [vmem:[#allocation2 + $0x100] sm:$0x3] %vm2652_vm6, %v7531_v41  ;;  %2686 = vst.msk [vmem:[#allocation2 + $0x118] sm:$0x3] %vm2652_vm6, %v7531_v41 }
 0x23d   : > { %6569 = vmatprep.mubr.msk.bf16.mxu0 %vm528_vm3, %v8062_v48  ;;  %2689 = vst.msk [vmem:[#allocation2 + $0x130] sm:$0x3] %vm2652_vm6, %v7531_v41  ;;  %2692 = vst.msk [vmem:[#allocation2 + $0x148] sm:$0x3] %vm2652_vm6, %v7531_v41 }
 0x23e   : > { %2695 = vst.msk [vmem:[#allocation2 + $0x160] sm:$0x3] %vm2652_vm6, %v7531_v41  ;;  %2698 = vst.msk [vmem:[#allocation2 + $0x178] sm:$0x3] %vm2652_vm6, %v7531_v41  ;;  %v2789_v56 = vld [vmem:[#allocation2 + $0x9] sm:$0xff] }
 0x23f   : > { %2701 = vst.msk [vmem:[#allocation2 + $0x190] sm:$0x3] %vm2652_vm6, %v7531_v41  ;;  %2704 = vst.msk [vmem:[#allocation2 + $0x1a8] sm:$0x3] %vm2652_vm6, %v7531_v41  ;;  %v2820_v50 = vpack.c.bf16 %v2789_v56, %v2788_v10 }
 0x241   : > { %6587 = vmatprep.mubr.msk.bf16.mxu1 %vm2649_vm5, %v2820_v50 }
 0x244   : > { %6570 = vmatmul.mubr.msk.bf16.gmra.mrb[16].mxu0 %vm528_vm3, %v8068_v54 }
 0x245   : > { %6573 = vmatprep.mubr.msk.bf16.mxu0 %vm528_vm3, %v8088_v12 }
 0x24c   : > { %6574 = vmatmul.mubr.msk.bf16.gmra.mrb[20].mxu0 %vm528_vm3, %v8096_v36 }
 0x24d   : > { %6577 = vmatprep.mubr.msk.bf16.mxu0 %vm528_vm3, %v8112_v47 }
 0x254   : > { %6578 = vmatmul.mubr.msk.bf16.gmra.mrb[24].mxu0 %vm528_vm3, %v8118_v49 }
 0x255   : > { %6581 = vmatprep.mubr.msk.bf16.mxu0 %vm528_vm3, %v8239_v45 }
 0x25c   : > { %6582 = vmatmul.mubr.msk.bf16.gmra.mrb[28].mxu0 %vm528_vm3, %v2376_v7 }
 0x2f7   : > { %v6555_v20 = vpop.f32.mrb[0].mxu0 }
 0x2f8   : > { %v2587_v37 = vadd.f32 %v6555_v20, %v8541_v32  ;;  %v2419_v48 = vpop.f32.mrb[1].mxu0 }
 0x2f9   : > { %v2585_v54 = vadd.f32 %v8541_v32, %v2419_v48  ;;  %v6556_v12 = vpop.f32.mrb[2].mxu0 }
 0x2fa   : > { %v2619_v53 = vmax.f32 %v2587_v37, 0.0  ;;  %v2588_v36 = vadd.f32 %v6556_v12, %v8541_v32  ;;  %v2422_v14 = vpop.f32.mrb[3].mxu0 }
 0x2fb   : > { %v2617_v47 = vmax.f32 %v2585_v54, 0.0  ;;  %v2586_v28 = vadd.f32 %v8541_v32, %v2422_v14 }
 0x2fc   : > { %2708 = vst.msk [vmem:[#allocation2 + $0x31] sm:$0xff] %vm2649_vm5, %v2619_v53  ;;  %v2620_v49 = vmax.f32 %v2588_v36, 0.0 }
 0x2fd   : > { %2706 = vst.msk [vmem:[#allocation2 + $0x19] sm:$0xff] %vm2649_vm5, %v2617_v47  ;;  %v2618_v62 = vmax.f32 %v2586_v28, 0.0 }
 0x2fe   : > { %2709 = vst.msk [vmem:[#allocation2 + $0x39] sm:$0xff] %vm2649_vm5, %v2620_v49 }
 0x2ff   : > { %2707 = vst.msk [vmem:[#allocation2 + $0x21] sm:$0xff] %vm2649_vm5, %v2618_v62  ;;  %v6559_v0 = vpop.f32.mrb[4].mxu0 }
 0x300   : > { %v2591_v51 = vadd.f32 %v6559_v0, %v8541_v32  ;;  %v2435_v35 = vpop.f32.mrb[5].mxu0 }
 0x301   : > { %v2589_v17 = vadd.f32 %v8541_v32, %v2435_v35  ;;  %v6560_v21 = vpop.f32.mrb[6].mxu0 }
 0x302   : > { %v2623_v42 = vmax.f32 %v2591_v51, 0.0  ;;  %v2592_v18 = vadd.f32 %v6560_v21, %v8541_v32  ;;  %v2438_v6 = vpop.f32.mrb[7].mxu0 }
 0x303   : > { %v2621_v25 = vmax.f32 %v2589_v17, 0.0  ;;  %v2590_v34 = vadd.f32 %v8541_v32, %v2438_v6  ;;  %v2792_v44 = vld [vmem:[#allocation2 + $0x31] sm:$0xff] }
 0x304   : > { %2712 = vst.msk [vmem:[#allocation2 + $0x61] sm:$0xff] %vm2649_vm5, %v2623_v42  ;;  %v2624_v45 = vmax.f32 %v2592_v18, 0.0  ;;  %v2790_v43 = vld [vmem:[#allocation2 + $0x19] sm:$0xff] }
 0x305   : > { %2710 = vst.msk [vmem:[#allocation2 + $0x49] sm:$0xff] %vm2649_vm5, %v2621_v25  ;;  %v2622_v46 = vmax.f32 %v2590_v34, 0.0  ;;  %v2793_v22 = vld [vmem:[#allocation2 + $0x39] sm:$0xff] }
 0x306   : > { %2713 = vst.msk [vmem:[#allocation2 + $0x69] sm:$0xff] %vm2649_vm5, %v2624_v45  ;;  %v2791_v40 = vld [vmem:[#allocation2 + $0x21] sm:$0xff]  ;;  %v8567_v11 = vpack.c.bf16 %v2793_v22, %v2792_v44 }
 0x307   : > { %2711 = vst.msk [vmem:[#allocation2 + $0x51] sm:$0xff] %vm2649_vm5, %v2622_v46  ;;  %v6563_v19 = vpop.f32.mrb[8].mxu0  ;;  %v8559_v33 = vpack.c.bf16 %v2791_v40, %v2790_v43 }
 0x308   : > { %v2595_v1 = vadd.f32 %v6563_v19, %v8541_v32  ;;  %v2451_v15 = vpop.f32.mrb[9].mxu0 }
 0x309   : > { %v2593_v16 = vadd.f32 %v8541_v32, %v2451_v15  ;;  %v6564_v30 = vpop.f32.mrb[10].mxu0  ;;  %6588 = vmatmul.mubr.msk.bf16.vlgmr.msra.gmra.mrb[0].mxu1 %vm2649_vm5, %v8559_v33 }
 0x30a   : > { %v2627_v13 = vmax.f32 %v2595_v1, 0.0  ;;  %v2596_v31 = vadd.f32 %v6564_v30, %v8541_v32  ;;  %v2454_v4 = vpop.f32.mrb[11].mxu0  ;;  %6591 = vmatprep.mubr.msk.bf16.mxu1 %vm2649_vm5, %v8567_v11  ;;  %6620 = vmatpush3.bf16.msra.mxu1 %v7456_v24 }
 0x30b   : > { %v2625_v38 = vmax.f32 %v2593_v16, 0.0  ;;  %v2594_v55 = vadd.f32 %v8541_v32, %v2454_v4  ;;  %6653 = vmatprep.subr.bf16.mxu1 %v8564_v52  ;;  %v2796_v23 = vld [vmem:[#allocation2 + $0x61] sm:$0xff] }
 0x30c   : > { %2716 = vst.msk [vmem:[#allocation2 + $0x91] sm:$0xff] %vm2649_vm5, %v2627_v13  ;;  %v2628_v39 = vmax.f32 %v2596_v31, 0.0  ;;  %v2794_v8 = vld [vmem:[#allocation2 + $0x49] sm:$0xff] }
 0x30d   : > { %2714 = vst.msk [vmem:[#allocation2 + $0x79] sm:$0xff] %vm2649_vm5, %v2625_v38  ;;  %v2626_v61 = vmax.f32 %v2594_v55, 0.0  ;;  %v2797_v63 = vld [vmem:[#allocation2 + $0x69] sm:$0xff] }
 0x30e   : > { %2717 = vst.msk [vmem:[#allocation2 + $0x99] sm:$0xff] %vm2649_vm5, %v2628_v39  ;;  %v2795_v9 = vld [vmem:[#allocation2 + $0x51] sm:$0xff]  ;;  %v8584_v57 = vpack.c.bf16 %v2797_v63, %v2796_v23 }
 0x30f   : > { %2715 = vst.msk [vmem:[#allocation2 + $0x81] sm:$0xff] %vm2649_vm5, %v2626_v61  ;;  %v6567_v26 = vpop.f32.mrb[12].mxu0  ;;  %v8581_v2 = vpack.c.bf16 %v2795_v9, %v2794_v8 }
 0x310   : > { %v2599_v3 = vadd.f32 %v6567_v26, %v8541_v32  ;;  %v2467_v7 = vpop.f32.mrb[13].mxu0 }
 0x311   : > { %v2597_v58 = vadd.f32 %v8541_v32, %v2467_v7  ;;  %v6568_v29 = vpop.f32.mrb[14].mxu0  ;;  %6592 = vmatmul.mubr.msk.bf16.gmra.mrb[4].mxu1 %vm2649_vm5, %v8581_v2 }
 0x312   : > { %v2631_v5 = vmax.f32 %v2599_v3, 0.0  ;;  %v2600_v59 = vadd.f32 %v6568_v29, %v8541_v32  ;;  %v2470_v60 = vpop.f32.mrb[15].mxu0  ;;  %6595 = vmatprep.mubr.msk.bf16.mxu1 %vm2649_vm5, %v8584_v57 }
 0x313   : > { %v2629_v27 = vmax.f32 %v2597_v58, 0.0  ;;  %v2598_v10 = vadd.f32 %v8541_v32, %v2470_v60  ;;  %v2800_v12 = vld [vmem:[#allocation2 + $0x91] sm:$0xff] }
 0x314   : > { %2720 = vst.msk [vmem:[#allocation2 + $0xc1] sm:$0xff] %vm2649_vm5, %v2631_v5  ;;  %v2632_v56 = vmax.f32 %v2600_v59, 0.0  ;;  %v2798_v20 = vld [vmem:[#allocation2 + $0x79] sm:$0xff] }
 0x315   : > { %2718 = vst.msk [vmem:[#allocation2 + $0xa9] sm:$0xff] %vm2649_vm5, %v2629_v27  ;;  %v2630_v50 = vmax.f32 %v2598_v10, 0.0  ;;  %v2801_v24 = vld [vmem:[#allocation2 + $0x99] sm:$0xff] }
 0x316   : > { %2721 = vst.msk [vmem:[#allocation2 + $0xc9] sm:$0xff] %vm2649_vm5, %v2632_v56  ;;  %v2799_v37 = vld [vmem:[#allocation2 + $0x81] sm:$0xff]  ;;  %v8600_v14 = vpack.c.bf16 %v2801_v24, %v2800_v12 }
 0x317   : > { %2719 = vst.msk [vmem:[#allocation2 + $0xb1] sm:$0xff] %vm2649_vm5, %v2630_v50  ;;  %v6571_v48 = vpop.f32.mrb[16].mxu0  ;;  %v8597_v54 = vpack.c.bf16 %v2799_v37, %v2798_v20 }
 0x318   : > { %v2603_v53 = vadd.f32 %v6571_v48, %v8541_v32  ;;  %v2483_v36 = vpop.f32.mrb[17].mxu0 }
 0x319   : > { %v2601_v47 = vadd.f32 %v8541_v32, %v2483_v36  ;;  %v6572_v28 = vpop.f32.mrb[18].mxu0  ;;  %6596 = vmatmul.mubr.msk.bf16.gmra.mrb[8].mxu1 %vm2649_vm5, %v8597_v54 }
 0x31a   : > { %v2635_v49 = vmax.f32 %v2603_v53, 0.0  ;;  %v2604_v62 = vadd.f32 %v6572_v28, %v8541_v32  ;;  %v2486_v0 = vpop.f32.mrb[19].mxu0  ;;  %6599 = vmatprep.mubr.msk.bf16.mxu1 %vm2649_vm5, %v8600_v14 }
 0x31b   : > { %v2633_v51 = vmax.f32 %v2601_v47, 0.0  ;;  %v2602_v35 = vadd.f32 %v8541_v32, %v2486_v0  ;;  %v2804_v45 = vld [vmem:[#allocation2 + $0xc1] sm:$0xff] }
 0x31c   : > { %2724 = vst.msk [vmem:[#allocation2 + $0xf1] sm:$0xff] %vm2649_vm5, %v2635_v49  ;;  %v2636_v17 = vmax.f32 %v2604_v62, 0.0  ;;  %v2802_v18 = vld [vmem:[#allocation2 + $0xa9] sm:$0xff] }
 0x31d   : > { %2722 = vst.msk [vmem:[#allocation2 + $0xd9] sm:$0xff] %vm2649_vm5, %v2633_v51  ;;  %v2634_v21 = vmax.f32 %v2602_v35, 0.0  ;;  %v2805_v42 = vld [vmem:[#allocation2 + $0xc9] sm:$0xff] }
 0x31e   : > { %2725 = vst.msk [vmem:[#allocation2 + $0xf9] sm:$0xff] %vm2649_vm5, %v2636_v17  ;;  %v2803_v6 = vld [vmem:[#allocation2 + $0xb1] sm:$0xff]  ;;  %v8616_v43 = vpack.c.bf16 %v2805_v42, %v2804_v45 }
 0x31f   : > { %2723 = vst.msk [vmem:[#allocation2 + $0xe1] sm:$0xff] %vm2649_vm5, %v2634_v21  ;;  %v6575_v25 = vpop.f32.mrb[20].mxu0  ;;  %v8613_v34 = vpack.c.bf16 %v2803_v6, %v2802_v18 }
 0x320   : > { %v2607_v46 = vadd.f32 %v6575_v25, %v8541_v32  ;;  %v2499_v22 = vpop.f32.mrb[21].mxu0 }
 0x321   : > { %v2605_v40 = vadd.f32 %v8541_v32, %v2499_v22  ;;  %v6576_v19 = vpop.f32.mrb[22].mxu0  ;;  %6600 = vmatmul.mubr.msk.bf16.gmra.mrb[12].mxu1 %vm2649_vm5, %v8613_v34 }
 0x322   : > { %v2639_v44 = vmax.f32 %v2607_v46, 0.0  ;;  %v2608_v1 = vadd.f32 %v6576_v19, %v8541_v32  ;;  %v2502_v15 = vpop.f32.mrb[23].mxu0  ;;  %6603 = vmatprep.mubr.msk.bf16.mxu1 %vm2649_vm5, %v8616_v43  ;;  %v2739_v46 = vld [vmem:[#allocation2 + $0x8] sm:$0xff] }
 0x323   : > { %v2637_v16 = vmax.f32 %v2605_v40, 0.0  ;;  %v2606_v30 = vadd.f32 %v8541_v32, %v2502_v15  ;;  %v2808_v63 = vld [vmem:[#allocation2 + $0xf1] sm:$0xff] }
 0x324   : > { %2728 = vst.msk [vmem:[#allocation2 + $0x121] sm:$0xff] %vm2649_vm5, %v2639_v44  ;;  %v2640_v13 = vmax.f32 %v2608_v1, 0.0  ;;  %v2806_v38 = vld [vmem:[#allocation2 + $0xd9] sm:$0xff] }
 0x325   : > { %2726 = vst.msk [vmem:[#allocation2 + $0x109] sm:$0xff] %vm2649_vm5, %v2637_v16  ;;  %v2638_v31 = vmax.f32 %v2606_v30, 0.0  ;;  %v2809_v4 = vld [vmem:[#allocation2 + $0xf9] sm:$0xff] }
 0x326   : > { %2729 = vst.msk [vmem:[#allocation2 + $0x129] sm:$0xff] %vm2649_vm5, %v2640_v13  ;;  %v2807_v55 = vld [vmem:[#allocation2 + $0xe1] sm:$0xff]  ;;  %v8632_v26 = vpack.c.bf16 %v2809_v4, %v2808_v63  ;;  %v2743_v15 = vld [vmem:[#allocation2 + $0x38] sm:$0xff]  ;;  %v2742_v13 = vld [vmem:[#allocation2 + $0x30] sm:$0xff] }
 0x327   : > { %2727 = vst.msk [vmem:[#allocation2 + $0x111] sm:$0xff] %vm2649_vm5, %v2638_v31  ;;  %v6579_v39 = vpop.f32.mrb[24].mxu0  ;;  %v8629_v61 = vpack.c.bf16 %v2807_v55, %v2806_v38  ;;  %v2741_v1 = vld [vmem:[#allocation2 + $0x20] sm:$0xff]  ;;  %v2740_v16 = vld [vmem:[#allocation2 + $0x18] sm:$0xff]  ;;  %v8681_v4 = vpack.c.bf16 %v2743_v15, %v2742_v13  ;;  %v2745_v38 = vld [vmem:[#allocation2 + $0x50] sm:$0xff] }
 0x328   : > { %v2611_v8 = vadd.f32 %v6579_v39, %v8541_v32  ;;  %v2515_v9 = vpop.f32.mrb[25].mxu0  ;;  %v8674_v30 = vpack.c.bf16 %v2741_v1, %v2740_v16  ;;  %v8679_v31 = vld [vmem:[%s9133_s3 + $0x18] sm:$0xff]   ;;  %v2747_v55 = vld [vmem:[#allocation2 + $0x68] sm:$0xff] }
 0x329   : > { %v2609_v23 = vadd.f32 %v8541_v32, %v2515_v9  ;;  %v6580_v3 = vpop.f32.mrb[26].mxu0  ;;  %6604 = vmatmul.mubr.msk.bf16.gmra.mrb[16].mxu1 %vm2649_vm5, %v8629_v61  ;;  %v2744_v39 = vld [vmem:[#allocation2 + $0x48] sm:$0xff]  ;;  %v3271_v15 = vld [vmem:[#allocation2 + $0x1a] sm:$0xff]  ;;  %v3273_v13 = vld [vmem:[#allocation2 + $0x32] sm:$0xff] }
 0x32a   : > { %v2643_v7 = vmax.f32 %v2611_v8, 0.0  ;;  %v2612_v58 = vadd.f32 %v6580_v3, %v8541_v32  ;;  %v2518_v29 = vpop.f32.mrb[27].mxu0  ;;  %6607 = vmatprep.mubr.msk.bf16.mxu1 %vm2649_vm5, %v8632_v26  ;;  %v8689_v63 = vpack.c.bf16 %v2745_v38, %v2744_v39  ;;  %v2746_v8 = vld [vmem:[#allocation2 + $0x60] sm:$0xff]  ;;  %v2751_v3 = vld [vmem:[#allocation2 + $0x98] sm:$0xff] }
 0x32b   : > { %v2641_v5 = vmax.f32 %v2609_v23, 0.0  ;;  %v2610_v59 = vadd.f32 %v8541_v32, %v2518_v29  ;;  %v2812_v37 = vld [vmem:[#allocation2 + $0x121] sm:$0xff]  ;;  %v8691_v9 = vpack.c.bf16 %v2747_v55, %v2746_v8 }
 0x32c   : > { %2732 = vst.msk [vmem:[#allocation2 + $0x151] sm:$0xff] %vm2649_vm5, %v2643_v7  ;;  %v2644_v60 = vmax.f32 %v2612_v58, 0.0  ;;  %v2810_v56 = vld [vmem:[#allocation2 + $0x109] sm:$0xff]  ;;  %v2749_v23 = vld [vmem:[#allocation2 + $0x80] sm:$0xff]  ;;  %v2748_v7 = vld [vmem:[#allocation2 + $0x78] sm:$0xff] }
 0x32d   : > { %2730 = vst.msk [vmem:[#allocation2 + $0x139] sm:$0xff] %vm2649_vm5, %v2641_v5  ;;  %v2642_v27 = vmax.f32 %v2610_v59, 0.0  ;;  %v2813_v10 = vld [vmem:[#allocation2 + $0x129] sm:$0xff]  ;;  %v3274_v38 = vld [vmem:[#allocation2 + $0x3a] sm:$0xff] }
 0x32e   : > { %2733 = vst.msk [vmem:[#allocation2 + $0x159] sm:$0xff] %vm2649_vm5, %v2644_v60  ;;  %v2811_v50 = vld [vmem:[#allocation2 + $0x111] sm:$0xff]  ;;  %v8648_v53 = vpack.c.bf16 %v2813_v10, %v2812_v37  ;;  %v2755_v59 = vld [vmem:[#allocation2 + $0xc8] sm:$0xff]  ;;  %v2754_v10 = vld [vmem:[#allocation2 + $0xc0] sm:$0xff]  ;;  %v8747_v8 = vpack.c.bf16 %v3274_v38, %v3273_v13 }
 0x32f   : > { %2731 = vst.msk [vmem:[#allocation2 + $0x141] sm:$0xff] %vm2649_vm5, %v2642_v27  ;;  %v6583_v24 = vpop.f32.mrb[28].mxu0  ;;  %v8645_v20 = vpack.c.bf16 %v2811_v50, %v2810_v56  ;;  %v2750_v58 = vld [vmem:[#allocation2 + $0x90] sm:$0xff]  ;;  %v2752_v60 = vld [vmem:[#allocation2 + $0xa8] sm:$0xff]  ;;  %v8707_v56 = vpack.c.bf16 %v2755_v59, %v2754_v10  ;;  %v2757_v50 = vld [vmem:[#allocation2 + $0xe0] sm:$0xff] }
 0x330   : > { %v2615_v48 = vadd.f32 %v6583_v24, %v8541_v32  ;;  %v2531_v12 = vpop.f32.mrb[29].mxu0  ;;  %v8699_v29 = vpack.c.bf16 %v2751_v3, %v2750_v58  ;;  %v2753_v5 = vld [vmem:[#allocation2 + $0xb0] sm:$0xff]  ;;  %v2759_v24 = vld [vmem:[#allocation2 + $0xf8] sm:$0xff]  ;;  %v3272_v16 = vld [vmem:[#allocation2 + $0x22] sm:$0xff] }
 0x331   : > { %v2613_v36 = vadd.f32 %v8541_v32, %v2531_v12  ;;  %v6584_v47 = vpop.f32.mrb[30].mxu0  ;;  %6608 = vmatmul.mubr.msk.bf16.gmra.mrb[20].mxu1 %vm2649_vm5, %v8645_v20  ;;  %v8705_v27 = vpack.c.bf16 %v2753_v5, %v2752_v60  ;;  %v2756_v37 = vld [vmem:[#allocation2 + $0xd8] sm:$0xff]  ;;  %v2758_v12 = vld [vmem:[#allocation2 + $0xf0] sm:$0xff]  ;;  %v8742_v55 = vpack.c.bf16 %v3272_v16, %v3271_v15  ;;  %v7459_v39 = vld [vmem:[%s9133_s3 + $0x20] sm:$0xff]  }
 0x332   : > { %v2647_v28 = vmax.f32 %v2615_v48, 0.0  ;;  %v2616_v49 = vadd.f32 %v6584_v47, %v8541_v32  ;;  %v2534_v62 = vpop.f32.mrb[31].mxu0  ;;  %6611 = vmatprep.mubr.msk.bf16.mxu1 %vm2649_vm5, %v8648_v53  ;;  %v8713_v48 = vpack.c.bf16 %v2757_v50, %v2756_v37  ;;  %v2761_v47 = vld [vmem:[#allocation2 + $0x110] sm:$0xff]  ;;  %v3279_v60 = vld [vmem:[#allocation2 + $0x7a] sm:$0xff]  ;;  %v3280_v10 = vld [vmem:[#allocation2 + $0x82] sm:$0xff] }
 0x333   : > { %v2645_v0 = vmax.f32 %v2613_v36, 0.0  ;;  %v2614_v51 = vadd.f32 %v8541_v32, %v2534_v62  ;;  %v2816_v25 = vld [vmem:[#allocation2 + $0x151] sm:$0xff]  ;;  %v2738_v32 = vld [vmem:[#allocation2] sm:$0xff]  ;;  %v8715_v36 = vpack.c.bf16 %v2759_v24, %v2758_v12 }
 0x334   : > { %2736 = vst.msk [vmem:[#allocation2 + $0x181] sm:$0xff] %vm2649_vm5, %v2647_v28  ;;  %v2648_v35 = vmax.f32 %v2616_v49, 0.0  ;;  %v2814_v42 = vld [vmem:[#allocation2 + $0x139] sm:$0xff]  ;;  %v2770_v19 = vpack.c.bf16 %v2739_v46, %v2738_v32  ;;  %v2763_v28 = vld [vmem:[#allocation2 + $0x128] sm:$0xff] }
 0x335   : > { %2734 = vst.msk [vmem:[#allocation2 + $0x169] sm:$0xff] %vm2649_vm5, %v2645_v0  ;;  %v2646_v17 = vmax.f32 %v2614_v51, 0.0  ;;  %v2817_v21 = vld [vmem:[#allocation2 + $0x159] sm:$0xff]  ;;  %v2760_v49 = vld [vmem:[#allocation2 + $0x108] sm:$0xff] }
 0x336   : > { %2737 = vst.msk [vmem:[#allocation2 + $0x189] sm:$0xff] %vm2649_vm5, %v2648_v35  ;;  %v2815_v18 = vld [vmem:[#allocation2 + $0x141] sm:$0xff]  ;;  %v8663_v45 = vpack.c.bf16 %v2817_v21, %v2816_v25  ;;  %v8721_v62 = vpack.c.bf16 %v2761_v47, %v2760_v49  ;;  %v2764_v21 = vld [vmem:[#allocation2 + $0x138] sm:$0xff]  ;;  %v3270_v46 = vld [vmem:[#allocation2 + $0xa] sm:$0xff] }
 0x337   : > { %2735 = vst.msk [vmem:[#allocation2 + $0x171] sm:$0xff] %vm2649_vm5, %v2646_v17  ;;  %v8661_v6 = vpack.c.bf16 %v2815_v18, %v2814_v42  ;;  %v2762_v0 = vld [vmem:[#allocation2 + $0x120] sm:$0xff]  ;;  %v2767_v17 = vld [vmem:[#allocation2 + $0x158] sm:$0xff]  ;;  %v2766_v18 = vld [vmem:[#allocation2 + $0x150] sm:$0xff] }
 0x338   : > { %v8723_v51 = vpack.c.bf16 %v2763_v28, %v2762_v0  ;;  %v2765_v35 = vld [vmem:[#allocation2 + $0x140] sm:$0xff]  ;;  %v8731_v25 = vpack.c.bf16 %v2767_v17, %v2766_v18  ;;  %v3276_v3 = vld [vmem:[#allocation2 + $0x52] sm:$0xff]  ;;  %v3278_v58 = vld [vmem:[#allocation2 + $0x6a] sm:$0xff] }
 0x339   : > { %6612 = vmatmul.mubr.msk.bf16.gmra.mrb[24].mxu1 %vm2649_vm5, %v8661_v6  ;;  %v8729_v42 = vpack.c.bf16 %v2765_v35, %v2764_v21  ;;  %v3269_v32 = vld [vmem:[#allocation2 + $0x2] sm:$0xff]  ;;  %v3281_v50 = vld [vmem:[#allocation2 + $0x92] sm:$0xff]  ;;  %v3282_v24 = vld [vmem:[#allocation2 + $0x9a] sm:$0xff] }
 0x33a   : > { %6615 = vmatprep.mubr.msk.bf16.mxu1 %vm2649_vm5, %v8663_v45  ;;  %v8764_v37 = vpack.c.bf16 %v3282_v24, %v3281_v50  ;;  %v3283_v12 = vld [vmem:[#allocation2 + $0xaa] sm:$0xff]  ;;  %v3284_v47 = vld [vmem:[#allocation2 + $0xb2] sm:$0xff]  ;;  %v3285_v28 = vld [vmem:[#allocation2 + $0xc2] sm:$0xff] }
 0x33b   : > { %v3286_v49 = vld [vmem:[#allocation2 + $0xca] sm:$0xff]  ;;  %v8770_v0 = vpack.c.bf16 %v3284_v47, %v3283_v12  ;;  %v3287_v17 = vld [vmem:[#allocation2 + $0xda] sm:$0xff]  ;;  %v3288_v21 = vld [vmem:[#allocation2 + $0xe2] sm:$0xff] }
 0x33c   : > { %v2818_v22 = vld [vmem:[#allocation2 + $0x169] sm:$0xff]  ;;  %v8772_v35 = vpack.c.bf16 %v3286_v49, %v3285_v28  ;;  %v3289_v18 = vld [vmem:[#allocation2 + $0xf2] sm:$0xff] }
 0x33d   : > { %v3293_v15 = vld [vmem:[#allocation2 + $0x122] sm:$0xff]  ;;  %v3294_v16 = vld [vmem:[#allocation2 + $0x12a] sm:$0xff] }
 0x33e   : > { %v2819_v40 = vld [vmem:[#allocation2 + $0x171] sm:$0xff]  ;;  %v8788_v38 = vpack.c.bf16 %v3294_v16, %v3293_v15  ;;  %v7460_v47 = vld [vmem:[%s9133_s3 + $0x28] sm:$0xff]  }
 0x33f   : > { %v8669_v44 = vpack.c.bf16 %v2819_v40, %v2818_v22  ;;  %v2769_v22 = vld [vmem:[#allocation2 + $0x170] sm:$0xff]  ;;  %v2768_v40 = vld [vmem:[#allocation2 + $0x168] sm:$0xff] }
 0x340   : > { %v8737_v1 = vpack.c.bf16 %v2769_v22, %v2768_v40  ;;  %v3291_v40 = vld [vmem:[#allocation2 + $0x10a] sm:$0xff]  ;;  %v3300_v24 = vld [vmem:[#allocation2 + $0x172] sm:$0xff] }
 0x341   : > { %6616 = vmatmul.mubr.msk.bf16.gmra.mrb[28].mxu1 %vm2649_vm5, %v8669_v44  ;;  %v3299_v50 = vld [vmem:[#allocation2 + $0x16a] sm:$0xff] }
 0x342   : > { %6621 = vmatprep.mubr.msk.bf16.mxu1 %vm2649_vm5, %v2770_v19  ;;  %v3301_v19 = vpack.c.bf16 %v3270_v46, %v3269_v32  ;;  %v3290_v32 = vld [vmem:[#allocation2 + $0xfa] sm:$0xff]  ;;  %v8778_v46 = vpack.c.bf16 %v3288_v21, %v3287_v17  ;;  %v8802_v12 = vpack.c.bf16 %v3300_v24, %v3299_v50  ;;  %v7461_v49 = vld [vmem:[%s9133_s3 + $0x30] sm:$0xff]  }
 0x343   : > { %v8780_v22 = vpack.c.bf16 %v3290_v32, %v3289_v18  ;;  %v7463_v17 = vld [vmem:[%s9133_s3 + $0x40] sm:$0xff]   ;;  %v4768_v32 = vld [vmem:[#allocation2 + $0x91] sm:$0xff] }
 0x344   : > { %v4766_v21 = vld [vmem:[#allocation2 + $0x79] sm:$0xff] }
 0x349   : > { %6622 = vmatmul.mubr.msk.bf16.vlgmr.msra.gmra.mrb[0].mxu1 %vm2649_vm5, %v8674_v30 }
 0x34a   : > { %6625 = vmatprep.mubr.msk.bf16.mxu1 %vm2649_vm5, %v8681_v4  ;;  %6654 = vmatpush3.bf16.msra.mxu1 %v8564_v52  ;;  %v8697_v52 = vpack.c.bf16 %v2749_v23, %v2748_v7  ;;  %v3275_v23 = vld [vmem:[#allocation2 + $0x4a] sm:$0xff]  ;;  %v3277_v7 = vld [vmem:[#allocation2 + $0x62] sm:$0xff] }
 0x34b   : > { %6687 = vmatprep.subr.bf16.mxu1 %v8679_v31  ;;  %v8754_v5 = vpack.c.bf16 %v3276_v3, %v3275_v23  ;;  %v8756_v59 = vpack.c.bf16 %v3278_v58, %v3277_v7  ;;  %v3295_v23 = vld [vmem:[#allocation2 + $0x13a] sm:$0xff]  ;;  %v3296_v3 = vld [vmem:[#allocation2 + $0x142] sm:$0xff]  ;;  %v3297_v7 = vld [vmem:[#allocation2 + $0x152] sm:$0xff] }
 0x34c   : > { %v3298_v58 = vld [vmem:[#allocation2 + $0x15a] sm:$0xff] }
 0x351   : > { %6626 = vmatmul.mubr.msk.bf16.gmra.mrb[4].mxu1 %vm2649_vm5, %v8689_v63 }
 0x352   : > { %6629 = vmatprep.mubr.msk.bf16.mxu1 %vm2649_vm5, %v8691_v9 }
 0x359   : > { %6630 = vmatmul.mubr.msk.bf16.gmra.mrb[8].mxu1 %vm2649_vm5, %v8697_v52 }
 0x35a   : > { %6633 = vmatprep.mubr.msk.bf16.mxu1 %vm2649_vm5, %v8699_v29 }
 0x361   : > { %6634 = vmatmul.mubr.msk.bf16.gmra.mrb[12].mxu1 %vm2649_vm5, %v8705_v27 }
 0x362   : > { %6637 = vmatprep.mubr.msk.bf16.mxu1 %vm2649_vm5, %v8707_v56 }
 0x369   : > { %6638 = vmatmul.mubr.msk.bf16.gmra.mrb[16].mxu1 %vm2649_vm5, %v8713_v48 }
 0x36a   : > { %6641 = vmatprep.mubr.msk.bf16.mxu1 %vm2649_vm5, %v8715_v36 }
 0x371   : > { %6642 = vmatmul.mubr.msk.bf16.gmra.mrb[20].mxu1 %vm2649_vm5, %v8721_v62 }
 0x372   : > { %6645 = vmatprep.mubr.msk.bf16.mxu1 %vm2649_vm5, %v8723_v51 }
 0x379   : > { %6646 = vmatmul.mubr.msk.bf16.gmra.mrb[24].mxu1 %vm2649_vm5, %v8729_v42 }
 0x37a   : > { %6649 = vmatprep.mubr.msk.bf16.mxu1 %vm2649_vm5, %v8731_v25 }
 0x381   : > { %6650 = vmatmul.mubr.msk.bf16.gmra.mrb[28].mxu1 %vm2649_vm5, %v8737_v1 }
 0x382   : > { %6655 = vmatprep.mubr.msk.bf16.mxu1 %vm2649_vm5, %v3301_v19  ;;  %v3292_v19 = vld [vmem:[#allocation2 + $0x112] sm:$0xff] }
 0x383   : > { %v8786_v13 = vpack.c.bf16 %v3292_v19, %v3291_v40 }
 0x389   : > { %6656 = vmatmul.mubr.msk.bf16.vlgmr.msra.gmra.mrb[0].mxu1 %vm2649_vm5, %v8742_v55 }
 0x38a   : > { %6659 = vmatprep.mubr.msk.bf16.mxu1 %vm2649_vm5, %v8747_v8  ;;  %6688 = vmatpush3.bf16.msra.mxu1 %v8679_v31  ;;  %v8762_v31 = vpack.c.bf16 %v3280_v10, %v3279_v60  ;;  %v8794_v60 = vpack.c.bf16 %v3296_v3, %v3295_v23  ;;  %v8796_v10 = vpack.c.bf16 %v3298_v58, %v3297_v7 }
 0x38b   : > { %6721 = vmatprep.subr.bf16.mxu1 %v7459_v39 }
 0x391   : > { %6660 = vmatmul.mubr.msk.bf16.gmra.mrb[4].mxu1 %vm2649_vm5, %v8754_v5 }
 0x392   : > { %6663 = vmatprep.mubr.msk.bf16.mxu1 %vm2649_vm5, %v8756_v59 }
 0x399   : > { %6664 = vmatmul.mubr.msk.bf16.gmra.mrb[8].mxu1 %vm2649_vm5, %v8762_v31 }
 0x39a   : > { %6667 = vmatprep.mubr.msk.bf16.mxu1 %vm2649_vm5, %v8764_v37 }
 0x3a1   : > { %6668 = vmatmul.mubr.msk.bf16.gmra.mrb[12].mxu1 %vm2649_vm5, %v8770_v0 }
 0x3a2   : > { %6671 = vmatprep.mubr.msk.bf16.mxu1 %vm2649_vm5, %v8772_v35 }
 0x3a9   : > { %6672 = vmatmul.mubr.msk.bf16.gmra.mrb[16].mxu1 %vm2649_vm5, %v8778_v46 }
 0x3aa   : > { %6675 = vmatprep.mubr.msk.bf16.mxu1 %vm2649_vm5, %v8780_v22 }
 0x3b1   : > { %6676 = vmatmul.mubr.msk.bf16.gmra.mrb[20].mxu1 %vm2649_vm5, %v8786_v13 }
 0x3b2   : > { %6679 = vmatprep.mubr.msk.bf16.mxu1 %vm2649_vm5, %v8788_v38 }
 0x3b9   : > { %6680 = vmatmul.mubr.msk.bf16.gmra.mrb[24].mxu1 %vm2649_vm5, %v8794_v60 }
 0x3ba   : > { %6683 = vmatprep.mubr.msk.bf16.mxu1 %vm2649_vm5, %v8796_v10 }
 0x3c1   : > { %6684 = vmatmul.mubr.msk.bf16.gmra.mrb[28].mxu1 %vm2649_vm5, %v8802_v12 }
 0x3c2   : > { %6689 = vmatprep.mubr.msk.bf16.mxu1 %vm2649_vm5, %v8674_v30  ;;  %v3598_v30 = vld [vmem:[#allocation2 + $0x188] sm:$0xff] }
 0x3c9   : > { %6690 = vmatmul.mubr.msk.bf16.vlgmr.msra.gmra.mrb[0].mxu1 %vm2649_vm5, %v8681_v4 }
 0x3ca   : > { %6693 = vmatprep.mubr.msk.bf16.mxu1 %vm2649_vm5, %v8689_v63  ;;  %6722 = vmatpush3.bf16.msra.mxu1 %v7459_v39  ;;  %v3597_v39 = vld [vmem:[#allocation2 + $0x180] sm:$0xff] }
 0x3cb   : > { %6755 = vmatprep.subr.bf16.mxu1 %v7460_v47  ;;  %v8839_v28 = vpack.c.bf16 %v3598_v30, %v3597_v39 }
 0x3d1   : > { %6694 = vmatmul.mubr.msk.bf16.gmra.mrb[4].mxu1 %vm2649_vm5, %v8691_v9 }
 0x3d2   : > { %6697 = vmatprep.mubr.msk.bf16.mxu1 %vm2649_vm5, %v8697_v52 }
 0x3d9   : > { %6698 = vmatmul.mubr.msk.bf16.gmra.mrb[8].mxu1 %vm2649_vm5, %v8699_v29 }
 0x3da   : > { %6701 = vmatprep.mubr.msk.bf16.mxu1 %vm2649_vm5, %v8705_v27 }
 0x3e1   : > { %6702 = vmatmul.mubr.msk.bf16.gmra.mrb[12].mxu1 %vm2649_vm5, %v8707_v56 }
 0x3e2   : > { %6705 = vmatprep.mubr.msk.bf16.mxu1 %vm2649_vm5, %v8713_v48 }
 0x3e9   : > { %6706 = vmatmul.mubr.msk.bf16.gmra.mrb[16].mxu1 %vm2649_vm5, %v8715_v36 }
 0x3ea   : > { %6709 = vmatprep.mubr.msk.bf16.mxu1 %vm2649_vm5, %v8721_v62 }
 0x3f1   : > { %6710 = vmatmul.mubr.msk.bf16.gmra.mrb[20].mxu1 %vm2649_vm5, %v8723_v51 }
 0x3f2   : > { %6713 = vmatprep.mubr.msk.bf16.mxu1 %vm2649_vm5, %v8729_v42 }
 0x3f9   : > { %6714 = vmatmul.mubr.msk.bf16.gmra.mrb[24].mxu1 %vm2649_vm5, %v8731_v25 }
 0x3fa   : > { %6717 = vmatprep.mubr.msk.bf16.mxu1 %vm2649_vm5, %v8737_v1 }
 0x401   : > { %6718 = vmatmul.mubr.msk.bf16.gmra.mrb[28].mxu1 %vm2649_vm5, %v8839_v28 }
 0x402   : > { %6723 = vmatprep.mubr.msk.bf16.mxu1 %vm2649_vm5, %v8559_v33  ;;  %v3896_v33 = vld [vmem:[#allocation2 + $0x189] sm:$0xff] }
 0x409   : > { %6724 = vmatmul.mubr.msk.bf16.vlgmr.msra.gmra.mrb[0].mxu1 %vm2649_vm5, %v8567_v11  ;;  %v3895_v11 = vld [vmem:[#allocation2 + $0x181] sm:$0xff] }
 0x40a   : > { %6727 = vmatprep.mubr.msk.bf16.mxu1 %vm2649_vm5, %v8581_v2  ;;  %6756 = vmatpush3.bf16.msra.mxu1 %v7460_v47  ;;  %v8876_v2 = vpack.c.bf16 %v3896_v33, %v3895_v11 }
 0x40b   : > { %6789 = vmatprep.subr.bf16.mxu1 %v7461_v49 }
 0x411   : > { %6728 = vmatmul.mubr.msk.bf16.gmra.mrb[4].mxu1 %vm2649_vm5, %v8584_v57  ;;  %v7462_v57 = vld [vmem:[%s9133_s3 + $0x38] sm:$0xff]  }
 0x412   : > { %6731 = vmatprep.mubr.msk.bf16.mxu1 %vm2649_vm5, %v8597_v54  ;;  %v4193_v54 = vld [vmem:[#allocation2 + $0x182] sm:$0xff] }
 0x419   : > { %6732 = vmatmul.mubr.msk.bf16.gmra.mrb[8].mxu1 %vm2649_vm5, %v8600_v14  ;;  %v4194_v14 = vld [vmem:[#allocation2 + $0x18a] sm:$0xff] }
 0x41a   : > { %6735 = vmatprep.mubr.msk.bf16.mxu1 %vm2649_vm5, %v8613_v34 }
 0x421   : > { %6736 = vmatmul.mubr.msk.bf16.gmra.mrb[12].mxu1 %vm2649_vm5, %v8616_v43 }
 0x422   : > { %6739 = vmatprep.mubr.msk.bf16.mxu1 %vm2649_vm5, %v8629_v61 }
 0x429   : > { %6740 = vmatmul.mubr.msk.bf16.gmra.mrb[16].mxu1 %vm2649_vm5, %v8632_v26 }
 0x42a   : > { %6743 = vmatprep.mubr.msk.bf16.mxu1 %vm2649_vm5, %v8645_v20 }
 0x431   : > { %6744 = vmatmul.mubr.msk.bf16.gmra.mrb[20].mxu1 %vm2649_vm5, %v8648_v53 }
 0x432   : > { %6747 = vmatprep.mubr.msk.bf16.mxu1 %vm2649_vm5, %v8661_v6 }
 0x439   : > { %6748 = vmatmul.mubr.msk.bf16.gmra.mrb[24].mxu1 %vm2649_vm5, %v8663_v45 }
 0x43a   : > { %6751 = vmatprep.mubr.msk.bf16.mxu1 %vm2649_vm5, %v8669_v44 }
 0x441   : > { %6752 = vmatmul.mubr.msk.bf16.gmra.mrb[28].mxu1 %vm2649_vm5, %v8876_v2 }
 0x442   : > { %6757 = vmatprep.mubr.msk.bf16.mxu1 %vm2649_vm5, %v8742_v55  ;;  %v8913_v55 = vpack.c.bf16 %v4194_v14, %v4193_v54 }
 0x449   : > { %6758 = vmatmul.mubr.msk.bf16.vlgmr.msra.gmra.mrb[0].mxu1 %vm2649_vm5, %v8747_v8 }
 0x44a   : > { %6761 = vmatprep.mubr.msk.bf16.mxu1 %vm2649_vm5, %v8754_v5  ;;  %6790 = vmatpush3.bf16.msra.mxu1 %v7461_v49 }
 0x44b   : > { %6823 = vmatprep.subr.bf16.mxu1 %v7462_v57 }
 0x451   : > { %6762 = vmatmul.mubr.msk.bf16.gmra.mrb[4].mxu1 %vm2649_vm5, %v8756_v59 }
 0x452   : > { %6765 = vmatprep.mubr.msk.bf16.mxu1 %vm2649_vm5, %v8762_v31 }
 0x459   : > { %6766 = vmatmul.mubr.msk.bf16.gmra.mrb[8].mxu1 %vm2649_vm5, %v8764_v37 }
 0x45a   : > { %6769 = vmatprep.mubr.msk.bf16.mxu1 %vm2649_vm5, %v8770_v0 }
 0x461   : > { %6770 = vmatmul.mubr.msk.bf16.gmra.mrb[12].mxu1 %vm2649_vm5, %v8772_v35 }
 0x462   : > { %6773 = vmatprep.mubr.msk.bf16.mxu1 %vm2649_vm5, %v8778_v46 }
 0x469   : > { %6774 = vmatmul.mubr.msk.bf16.gmra.mrb[16].mxu1 %vm2649_vm5, %v8780_v22 }
 0x46a   : > { %6777 = vmatprep.mubr.msk.bf16.mxu1 %vm2649_vm5, %v8786_v13 }
 0x471   : > { %6778 = vmatmul.mubr.msk.bf16.gmra.mrb[20].mxu1 %vm2649_vm5, %v8788_v38 }
 0x472   : > { %6781 = vmatprep.mubr.msk.bf16.mxu1 %vm2649_vm5, %v8794_v60 }
 0x479   : > { %6782 = vmatmul.mubr.msk.bf16.gmra.mrb[24].mxu1 %vm2649_vm5, %v8796_v10 }
 0x47a   : > { %6785 = vmatprep.mubr.msk.bf16.mxu1 %vm2649_vm5, %v8802_v12 }
 0x481   : > { %6786 = vmatmul.mubr.msk.bf16.gmra.mrb[28].mxu1 %vm2649_vm5, %v8913_v55 }
 0x482   : > { %6791 = vmatprep.mubr.msk.bf16.mxu1 %vm2649_vm5, %v8681_v4  ;;  %v4492_v4 = vld [vmem:[#allocation2 + $0x198] sm:$0xff] }
 0x489   : > { %6792 = vmatmul.mubr.msk.bf16.vlgmr.msra.gmra.mrb[0].mxu1 %vm2649_vm5, %v8689_v63  ;;  %v4493_v63 = vld [vmem:[#allocation2 + $0x1a0] sm:$0xff] }
 0x48a   : > { %6795 = vmatprep.mubr.msk.bf16.mxu1 %vm2649_vm5, %v8691_v9  ;;  %6824 = vmatpush3.bf16.msra.mxu1 %v7462_v57  ;;  %v4509_v9 = vpack.c.bf16 %v4493_v63, %v4492_v4 }
 0x48b   : > { %6857 = vmatprep.subr.bf16.mxu1 %v7463_v17 }
 0x491   : > { %6796 = vmatmul.mubr.msk.bf16.gmra.mrb[4].mxu1 %vm2649_vm5, %v8697_v52  ;;  %v4761_v52 = vld [vmem:[#allocation2 + $0x39] sm:$0xff] }
 0x492   : > { %6799 = vmatprep.mubr.msk.bf16.mxu1 %vm2649_vm5, %v8699_v29  ;;  %v4760_v29 = vld [vmem:[#allocation2 + $0x31] sm:$0xff] }
 0x499   : > { %6800 = vmatmul.mubr.msk.bf16.gmra.mrb[8].mxu1 %vm2649_vm5, %v8705_v27  ;;  %v4792_v27 = vpack.c.bf16 %v4761_v52, %v4760_v29 }
 0x49a   : > { %6803 = vmatprep.mubr.msk.bf16.mxu1 %vm2649_vm5, %v8707_v56  ;;  %v4763_v56 = vld [vmem:[#allocation2 + $0x51] sm:$0xff] }
 0x4a1   : > { %6804 = vmatmul.mubr.msk.bf16.gmra.mrb[12].mxu1 %vm2649_vm5, %v8713_v48  ;;  %v4765_v48 = vld [vmem:[#allocation2 + $0x69] sm:$0xff] }
 0x4a2   : > { %6807 = vmatprep.mubr.msk.bf16.mxu1 %vm2649_vm5, %v8715_v36  ;;  %v4762_v36 = vld [vmem:[#allocation2 + $0x49] sm:$0xff] }
 0x4a9   : > { %6808 = vmatmul.mubr.msk.bf16.gmra.mrb[16].mxu1 %vm2649_vm5, %v8721_v62  ;;  %v4793_v62 = vpack.c.bf16 %v4763_v56, %v4762_v36 }
 0x4aa   : > { %6811 = vmatprep.mubr.msk.bf16.mxu1 %vm2649_vm5, %v8723_v51  ;;  %v4764_v51 = vld [vmem:[#allocation2 + $0x61] sm:$0xff] }
 0x4b1   : > { %6812 = vmatmul.mubr.msk.bf16.gmra.mrb[20].mxu1 %vm2649_vm5, %v8729_v42  ;;  %v4794_v42 = vpack.c.bf16 %v4765_v48, %v4764_v51 }
 0x4b2   : > { %6815 = vmatprep.mubr.msk.bf16.mxu1 %vm2649_vm5, %v8731_v25  ;;  %v4767_v25 = vld [vmem:[#allocation2 + $0x81] sm:$0xff] }
 0x4b3   : > { %v4795_v18 = vpack.c.bf16 %v4767_v25, %v4766_v21 }
 0x4b9   : > { %6816 = vmatmul.mubr.msk.bf16.gmra.mrb[24].mxu1 %vm2649_vm5, %v8737_v1  ;;  %v4769_v1 = vld [vmem:[#allocation2 + $0x99] sm:$0xff] }
 0x4ba   : > { %6819 = vmatprep.mubr.msk.bf16.mxu1 %vm2649_vm5, %v8839_v28  ;;  %v4796_v40 = vpack.c.bf16 %v4769_v1, %v4768_v32 }
 0x4c1   : > { %6820 = vmatmul.mubr.msk.bf16.gmra.mrb[28].mxu1 %vm2649_vm5, %v4509_v9 }
 0x4c2   : > { %6825 = vmatprep.mubr.msk.bf16.mxu1 %vm2649_vm5, %v4792_v27 }
 0x4c9   : > { %6826 = vmatmul.mubr.msk.bf16.vlgmr.msra.gmra.mrb[0].mxu1 %vm2649_vm5, %v4793_v62 }
 0x4ca   : > { %6829 = vmatprep.mubr.msk.bf16.mxu1 %vm2649_vm5, %v4794_v42  ;;  %6858 = vmatpush3.bf16.msra.mxu1 %v7463_v17 }
 0x4cb   : > { %6891 = vmatprep.subr.bf16.mxu1 %v7531_v41 }
 0x4d1   : > { %6830 = vmatmul.mubr.msk.bf16.gmra.mrb[4].mxu1 %vm2649_vm5, %v4795_v18 }
 0x4d2   : > { %6833 = vmatprep.mubr.msk.bf16.mxu1 %vm2649_vm5, %v4796_v40 }
 0x4d9   : > { %6834 = vmatmul.mubr.msk.bf16.gmra.mrb[8].mxu1 %vm2649_vm5, %v8613_v34  ;;  %v4790_v34 = vld [vmem:[#allocation2 + $0x199] sm:$0xff] }
 0x4da   : > { %6837 = vmatprep.mubr.msk.bf16.mxu1 %vm2649_vm5, %v8616_v43  ;;  %v4791_v43 = vld [vmem:[#allocation2 + $0x1a1] sm:$0xff] }
 0x4e1   : > { %6838 = vmatmul.mubr.msk.bf16.gmra.mrb[12].mxu1 %vm2649_vm5, %v8629_v61  ;;  %v4807_v61 = vpack.c.bf16 %v4791_v43, %v4790_v34 }
 0x4e2   : > { %6841 = vmatprep.mubr.msk.bf16.mxu1 %vm2649_vm5, %v8632_v26  ;;  %v5088_v26 = vld [vmem:[#allocation2 + $0x19a] sm:$0xff] }
 0x4e9   : > { %6842 = vmatmul.mubr.msk.bf16.gmra.mrb[16].mxu1 %vm2649_vm5, %v8645_v20  ;;  %v5089_v20 = vld [vmem:[#allocation2 + $0x1a2] sm:$0xff] }
 0x4ea   : > { %6845 = vmatprep.mubr.msk.bf16.mxu1 %vm2649_vm5, %v8648_v53  ;;  %v5105_v53 = vpack.c.bf16 %v5089_v20, %v5088_v26 }
 0x4f1   : > { %6846 = vmatmul.mubr.msk.bf16.gmra.mrb[20].mxu1 %vm2649_vm5, %v8661_v6  ;;  %v7532_v6 = vmov 998259584  }
 0x4f2   : > { %6849 = vmatprep.mubr.msk.bf16.mxu1 %vm2649_vm5, %v8663_v45  ;;  %5475 = vmatprep.mubr.bf16.mxu0 %v7532_v6  ;;  %v7464_v45 = vld [vmem:[%s9135_s5] sm:$0xff]  }
 0x4f9   : > { %6850 = vmatmul.mubr.msk.bf16.gmra.mrb[24].mxu1 %vm2649_vm5, %v8669_v44  ;;  %v7465_v44 = vld [vmem:[%s9135_s5 + $0x8] sm:$0xff]  }
 0x4fa   : > { %6853 = vmatprep.mubr.msk.bf16.mxu1 %vm2649_vm5, %v8876_v2 }
 0x501   : > { %6854 = vmatmul.mubr.msk.bf16.gmra.mrb[28].mxu1 %vm2649_vm5, %v4807_v61 }
 0x502   : > { %6859 = vmatprep.mubr.msk.bf16.mxu1 %vm2649_vm5, %v8747_v8  ;;  %v9020_v8 = vld [vmem:[%s9134_s4] ss:$0 sm:$0xff] }
 0x509   : > { %6860 = vmatmul.mubr.msk.bf16.vlgmr.msra.gmra.mrb[0].mxu1 %vm2649_vm5, %v8754_v5 }
 0x50a   : > { %6863 = vmatprep.mubr.msk.bf16.mxu1 %vm2649_vm5, %v8756_v59  ;;  %6892 = vmatpush3.bf16.msra.mxu1 %v7464_v45 }
 0x50b   : > { %6893 = vmatprep.subr.bf16.mxu1 %v7531_v41 }
 0x50e   : > { %6894 = vmatpush3.bf16.msra.mxu1 %v7465_v44 }
 0x511   : > { %6864 = vmatmul.mubr.msk.bf16.gmra.mrb[4].mxu1 %vm2649_vm5, %v8762_v31 }
 0x512   : > { %6867 = vmatprep.mubr.msk.bf16.mxu1 %vm2649_vm5, %v8764_v37 }
 0x519   : > { %6868 = vmatmul.mubr.msk.bf16.gmra.mrb[8].mxu1 %vm2649_vm5, %v8770_v0 }
 0x51a   : > { %6871 = vmatprep.mubr.msk.bf16.mxu1 %vm2649_vm5, %v8772_v35 }
 0x521   : > { %6872 = vmatmul.mubr.msk.bf16.gmra.mrb[12].mxu1 %vm2649_vm5, %v8778_v46 }
 0x522   : > { %6875 = vmatprep.mubr.msk.bf16.mxu1 %vm2649_vm5, %v8780_v22 }
 0x529   : > { %6876 = vmatmul.mubr.msk.bf16.gmra.mrb[16].mxu1 %vm2649_vm5, %v8786_v13 }
 0x52a   : > { %6879 = vmatprep.mubr.msk.bf16.mxu1 %vm2649_vm5, %v8788_v38 }
 0x531   : > { %6880 = vmatmul.mubr.msk.bf16.gmra.mrb[20].mxu1 %vm2649_vm5, %v8794_v60 }
 0x532   : > { %6883 = vmatprep.mubr.msk.bf16.mxu1 %vm2649_vm5, %v8796_v10 }
 0x539   : > { %6884 = vmatmul.mubr.msk.bf16.gmra.mrb[24].mxu1 %vm2649_vm5, %v8802_v12 }
 0x53a   : > { %6887 = vmatprep.mubr.msk.bf16.mxu1 %vm2649_vm5, %v8913_v55 }
 0x541   : > { %6888 = vmatmul.mubr.msk.bf16.gmra.mrb[28].mxu1 %vm2649_vm5, %v5105_v53 }
 0x542   : > { %6895 = vmatprep.mubr.msk.bf16.mxu1 %vm7533_vm7, %v7531_v41 }
 0x5dc   : > { %v6861_v5 = vpop.f32.mrb[0].mxu1 }
 0x5dd   : > { %v5365_v59 = vadd.f32 %v6861_v5, %v9020_v8  ;;  %v5197_v31 = vpop.f32.mrb[1].mxu1 }
 0x5de   : > { %v5363_v37 = vadd.f32 %v9020_v8, %v5197_v31  ;;  %v6862_v0 = vpop.f32.mrb[2].mxu1 }
 0x5df   : > { %v5366_v35 = vadd.f32 %v6862_v0, %v9020_v8  ;;  %v5200_v46 = vpop.f32.mrb[3].mxu1  ;;  %v5397_v19 = vmax.f32 %v5365_v59, 0.0 }
 0x5e0   : > { %v5364_v22 = vadd.f32 %v9020_v8, %v5200_v46  ;;  %v5395_v16 = vmax.f32 %v5363_v37, 0.0 }
 0x5e1   : > { %v5398_v15 = vmax.f32 %v5366_v35, 0.0 }
 0x5e2   : > { %v5396_v13 = vmax.f32 %v5364_v22, 0.0 }
 0x5e3   : > { %v9026_v38 = vpack.c.bf16 %v5398_v15, %v5397_v19 }
 0x5e4   : > { %v9028_v23 = vpack.c.bf16 %v5396_v13, %v5395_v16  ;;  %v6865_v3 = vpop.f32.mrb[4].mxu1 }
 0x5e5   : > { %v5369_v7 = vadd.f32 %v6865_v3, %v9020_v8  ;;  %v5213_v58 = vpop.f32.mrb[5].mxu1 }
 0x5e6   : > { %v5367_v60 = vadd.f32 %v9020_v8, %v5213_v58  ;;  %v6866_v10 = vpop.f32.mrb[6].mxu1 }
 0x5e7   : > { %v5370_v50 = vadd.f32 %v6866_v10, %v9020_v8  ;;  %v5216_v24 = vpop.f32.mrb[7].mxu1  ;;  %v5401_v47 = vmax.f32 %v5369_v7, 0.0 }
 0x5e8   : > { %v5368_v12 = vadd.f32 %v9020_v8, %v5216_v24  ;;  %v5399_v39 = vmax.f32 %v5367_v60, 0.0 }
 0x5e9   : > { %v5402_v30 = vmax.f32 %v5370_v50, 0.0 }
 0x5ea   : > { %v5400_v28 = vmax.f32 %v5368_v12, 0.0 }
 0x5eb   : > { %v9034_v49 = vpack.c.bf16 %v5402_v30, %v5401_v47 }
 0x5ec   : > { %v9036_v33 = vpack.c.bf16 %v5400_v28, %v5399_v39  ;;  %v6869_v11 = vpop.f32.mrb[8].mxu1 }
 0x5ed   : > { %v5373_v2 = vadd.f32 %v6869_v11, %v9020_v8  ;;  %v5229_v57 = vpop.f32.mrb[9].mxu1 }
 0x5ee   : > { %v5371_v54 = vadd.f32 %v9020_v8, %v5229_v57  ;;  %v6870_v14 = vpop.f32.mrb[10].mxu1 }
 0x5ef   : > { %v5374_v55 = vadd.f32 %v6870_v14, %v9020_v8  ;;  %v5232_v17 = vpop.f32.mrb[11].mxu1  ;;  %v5405_v63 = vmax.f32 %v5373_v2, 0.0 }
 0x5f0   : > { %v5372_v4 = vadd.f32 %v9020_v8, %v5232_v17  ;;  %v5403_v52 = vmax.f32 %v5371_v54, 0.0 }
 0x5f1   : > { %v5406_v9 = vmax.f32 %v5374_v55, 0.0 }
 0x5f2   : > { %v5404_v29 = vmax.f32 %v5372_v4, 0.0 }
 0x5f3   : > { %v9042_v27 = vpack.c.bf16 %v5406_v9, %v5405_v63 }
 0x5f4   : > { %v9044_v56 = vpack.c.bf16 %v5404_v29, %v5403_v52  ;;  %v6873_v48 = vpop.f32.mrb[12].mxu1 }
 0x5f5   : > { %v5377_v36 = vadd.f32 %v6873_v48, %v9020_v8  ;;  %v5245_v62 = vpop.f32.mrb[13].mxu1 }
 0x5f6   : > { %v5375_v51 = vadd.f32 %v9020_v8, %v5245_v62  ;;  %v6874_v42 = vpop.f32.mrb[14].mxu1 }
 0x5f7   : > { %v5378_v25 = vadd.f32 %v6874_v42, %v9020_v8  ;;  %v5248_v1 = vpop.f32.mrb[15].mxu1  ;;  %v5409_v18 = vmax.f32 %v5377_v36, 0.0 }
 0x5f8   : > { %v5376_v21 = vadd.f32 %v9020_v8, %v5248_v1  ;;  %v5407_v40 = vmax.f32 %v5375_v51, 0.0 }
 0x5f9   : > { %v5410_v32 = vmax.f32 %v5378_v25, 0.0 }
 0x5fa   : > { %v5408_v34 = vmax.f32 %v5376_v21, 0.0 }
 0x5fb   : > { %v9050_v43 = vpack.c.bf16 %v5410_v32, %v5409_v18 }
 0x5fc   : > { %v9052_v61 = vpack.c.bf16 %v5408_v34, %v5407_v40  ;;  %v6877_v26 = vpop.f32.mrb[16].mxu1 }
 0x5fd   : > { %v5381_v20 = vadd.f32 %v6877_v26, %v9020_v8  ;;  %v5261_v53 = vpop.f32.mrb[17].mxu1 }
 0x5fe   : > { %v5379_v45 = vadd.f32 %v9020_v8, %v5261_v53  ;;  %v6878_v44 = vpop.f32.mrb[18].mxu1 }
 0x5ff   : > { %v5382_v5 = vadd.f32 %v6878_v44, %v9020_v8  ;;  %v5264_v59 = vpop.f32.mrb[19].mxu1  ;;  %v5413_v37 = vmax.f32 %v5381_v20, 0.0 }
 0x600   : > { %v5380_v31 = vadd.f32 %v9020_v8, %v5264_v59  ;;  %v5411_v35 = vmax.f32 %v5379_v45, 0.0 }
 0x601   : > { %v5414_v0 = vmax.f32 %v5382_v5, 0.0 }
 0x602   : > { %v5412_v46 = vmax.f32 %v5380_v31, 0.0 }
 0x603   : > { %v5436_v22 = vpack.c.bf16 %v5414_v0, %v5413_v37 }
 0x604   : > { %v5435_v19 = vpack.c.bf16 %v5412_v46, %v5411_v35  ;;  %v6881_v15 = vpop.f32.mrb[20].mxu1 }
 0x605   : > { %v5385_v16 = vadd.f32 %v6881_v15, %v9020_v8  ;;  %v5277_v13 = vpop.f32.mrb[21].mxu1 }
 0x606   : > { %v5383_v3 = vadd.f32 %v9020_v8, %v5277_v13  ;;  %v6882_v7 = vpop.f32.mrb[22].mxu1  ;;  %6254 = vmatprep.subr.bf16.mxu0 %v5435_v19 }
 0x607   : > { %v5386_v58 = vadd.f32 %v6882_v7, %v9020_v8  ;;  %v5280_v60 = vpop.f32.mrb[23].mxu1  ;;  %6255 = vmatpush3.bf16.msra.mxu0 %v9028_v23  ;;  %v5417_v50 = vmax.f32 %v5385_v16, 0.0 }
 0x608   : > { %v5384_v10 = vadd.f32 %v9020_v8, %v5280_v60  ;;  %6256 = vmatprep.subr.bf16.mxu0 %v5436_v22  ;;  %v5415_v12 = vmax.f32 %v5383_v3, 0.0 }
 0x609   : > { %v5418_v24 = vmax.f32 %v5386_v58, 0.0 }
 0x60a   : > { %v5416_v47 = vmax.f32 %v5384_v10, 0.0 }
 0x60b   : > { %v5438_v30 = vpack.c.bf16 %v5418_v24, %v5417_v50  ;;  %6257 = vmatpush3.bf16.msra.mxu0 %v9026_v38 }
 0x60c   : > { %v5437_v39 = vpack.c.bf16 %v5416_v47, %v5415_v12  ;;  %v6885_v28 = vpop.f32.mrb[24].mxu1 }
 0x60d   : > { %v5389_v11 = vadd.f32 %v6885_v28, %v9020_v8  ;;  %v5293_v2 = vpop.f32.mrb[25].mxu1 }
 0x60e   : > { %v5387_v57 = vadd.f32 %v9020_v8, %v5293_v2  ;;  %v6886_v54 = vpop.f32.mrb[26].mxu1  ;;  %6258 = vmatprep.subr.bf16.mxu0 %v5437_v39 }
 0x60f   : > { %v5390_v23 = vadd.f32 %v6886_v54, %v9020_v8  ;;  %v5296_v14 = vpop.f32.mrb[27].mxu1  ;;  %6259 = vmatpush3.bf16.msra.mxu0 %v9036_v33  ;;  %v5421_v17 = vmax.f32 %v5389_v11, 0.0 }
 0x610   : > { %v5388_v55 = vadd.f32 %v9020_v8, %v5296_v14  ;;  %6260 = vmatprep.subr.bf16.mxu0 %v5438_v30  ;;  %v5419_v38 = vmax.f32 %v5387_v57, 0.0 }
 0x611   : > { %v5422_v4 = vmax.f32 %v5390_v23, 0.0 }
 0x612   : > { %v5420_v63 = vmax.f32 %v5388_v55, 0.0 }
 0x613   : > { %v5440_v9 = vpack.c.bf16 %v5422_v4, %v5421_v17  ;;  %6261 = vmatpush3.bf16.msra.mxu0 %v9034_v49 }
 0x614   : > { %v5439_v52 = vpack.c.bf16 %v5420_v63, %v5419_v38  ;;  %v6889_v29 = vpop.f32.mrb[28].mxu1 }
 0x615   : > { %v5393_v48 = vadd.f32 %v6889_v29, %v9020_v8  ;;  %v5309_v36 = vpop.f32.mrb[29].mxu1 }
 0x616   : > { %v5391_v62 = vadd.f32 %v9020_v8, %v5309_v36  ;;  %v6890_v51 = vpop.f32.mrb[30].mxu1  ;;  %6262 = vmatprep.subr.bf16.mxu0 %v5439_v52 }
 0x617   : > { %v5394_v33 = vadd.f32 %v6890_v51, %v9020_v8  ;;  %v5312_v42 = vpop.f32.mrb[31].mxu1  ;;  %6263 = vmatpush3.bf16.msra.mxu0 %v9044_v56  ;;  %v5425_v1 = vmax.f32 %v5393_v48, 0.0 }
 0x618   : > { %v5392_v25 = vadd.f32 %v9020_v8, %v5312_v42  ;;  %6264 = vmatprep.subr.bf16.mxu0 %v5440_v9  ;;  %v5423_v49 = vmax.f32 %v5391_v62, 0.0 }
 0x619   : > { %v5426_v21 = vmax.f32 %v5394_v33, 0.0 }
 0x61a   : > { %v5424_v18 = vmax.f32 %v5392_v25, 0.0 }
 0x61b   : > { %v5442_v32 = vpack.c.bf16 %v5426_v21, %v5425_v1  ;;  %6265 = vmatpush3.bf16.msra.mxu0 %v9042_v27 }
 0x61c   : > { %v5441_v40 = vpack.c.bf16 %v5424_v18, %v5423_v49 }
 0x61e   : > { %6266 = vmatprep.subr.bf16.mxu0 %v5441_v40 }
 0x61f   : > { %6267 = vmatpush3.bf16.msra.mxu0 %v9052_v61  ;;  %v5488_v61 = vld [vmem:[%s9136_s6] sm:$0x1] }
 0x620   : > { %6268 = vmatprep.subr.bf16.mxu0 %v5442_v32 }
 0x623   : > { %6269 = vmatpush3.bf16.msra.mxu0 %v9050_v43 }
 0x626   : > { %5476 = vmatmul.mubr.bf16.vlgmr.msra.gmra.mrb[32].mxu0 %v7532_v6 }
 0x6f9   : > { %v6270_v8 = vpop.f32.mrb[32].mxu0 }
 0x6fa   : > { %v6271_v56 = vpop.f32.mrb[33].mxu0 }
 0x6fb   : > { %v6272_v34 = vadd.f32 %v6271_v56, %v6270_v8  ;;  %v6273_v26 = vpop.f32.mrb[34].mxu0 }
 0x6fc   : > { %v6274_v20 = vpop.f32.mrb[35].mxu0 }
 0x6fd   : > { %v5483_v27 = vpack.c.bf16 %v6272_v34, %v6272_v34 }
 0x6ff   : > { %6896 = vmatmul.mubr.msk.bf16.vlgmr.msra.gmra.mrb[32].mxu1 %vm5501_vm8, %v5483_v27 }
 0x7d2   : > { %v5539_v6 = vpop.f32.mrb[32].mxu1 }
 0x7d3   : > { %v5540_v43 = vadd.f32 %v5539_v6, %v5488_v61  ;;  %v6897_v41 = vpop.f32.mrb[33].mxu1 }
 0x7d4   : > { %v5542_v53 = vpop.f32.mrb[34].mxu1 }
 0x7d5   : > { %5545 = vst [vmem:[%s270_s29] sm:$0x1] %v5540_v43  ;;  %v6898_v45 = vpop.f32.mrb[35].mxu1 }
 0x7d6   : > { %7479 = shalt.err (!%p7476_p3)
}
 0x7d7   : > { %s7480_s19 = scalar_lea.hbm %s9088_s14, 16  ;;  %s7484_s21 = scalar_lea.hbm %s9137_s7, 32 }
 0x7d8   : > { %p7481_p4 = scmp.ne.s32.totalorder %s9088_s14, %s7480_s19  ;;  %p7485_p9 = scmp.lt.u32.totalorder %s9088_s14, %s9137_s7 }
 0x7d9   : > { %p7486_p10 = scmp.lt.u32.totalorder %s7484_s21, %s7480_s19  ;;  %p7488_p12 = scmp.lt.u32.totalorder %s7480_s19, %s9088_s14 }
 0x7da   : > { %p7482_p7 = pnand %p7481_p4, %p7613_p5 }
 0x7db   : > { %p7487_p11 = por %p7486_p10, %p7485_p9 }
 0x7dc   : > { %p7483_p8 = pneg %p7482_p7 }
 0x7dd   : > { %p7489_p13 = por %p7488_p12, %p7487_p11 }
 0x7df   : > { %p7490_p0 = pnand %p7489_p13, %p7483_p8 }
 0x7e1   : > { %7493 = shalt.err (!%p7490_p0)
}
 0x7e2   : > { %7412 = dma.vmem_to_hbm [thread:$0]  (%p7613_p5), %s9090_s8, 16, %s9088_s14, %s5547_s15  }
 0x7e3 PF: > { %p7418_p1 = scmp.ge.s32.totalorder %s7528_s27, 2  ;;  %s5571_s9 = sand.u32 1, %s7516_s24  }
 0x7e4   : > { %s5572_s13 = scalar_lea.sflag [#allocation4], %s5571_s9 }
 0x7e5   : > { %p7415_p2 = pnand %p7418_p1, %p7617_p6 }
 0x7e7   : > { %7511 = dma.done.wait (!%p7415_p2), %s5572_s13, 16  }
 0x7e8   : > { %7513 = vsyncadd (!%p7415_p2), %s5572_s13, 4294967280  ;;  %p17_p3 = scmp.ge.s32.totalorder %s7600_s30, 4   ;;  %s9221_s24 = smov %s7520_s25 }
 0x7e9   : > { %s9222_s25 = smov %s7524_s26  ;;  %s9223_s26 = smov %s7611_s10 }
 0x7ea   : > { %s9224_s27 = smov %s7600_s30  ;;  %19 = sbr.rel (!%p17_p3) target bundleno = 3 (0x3), region = 101 }
 0x7f1   :  { %5576 = vsyncpa [#allocation4], 1 }
 0x7f2   :  { %5578 = vsyncpa [#allocation4 + $0x1], 1 }

</bundles_post_ra>
